<compile_context>
chip_gen: v5e
topology: v5e:2x2
jax: 0.10.0
libtpu: 0.0.40
codegen_flags: <defaults>
</compile_context>

<pallas_src>
import jax
import jax.numpy as jnp
from jax.experimental import pallas as pl
from jax.experimental.pallas import tpu as pltpu


_BN_EPS = 1e-5
_LANE = 128


# ------------------------------ Pallas kernel -------------------------------

def _fused_forward_kernel(
    x_ref, stem_w_ref, stem_b_ref,
    w1_ref, b1_ref, w2_ref, b2_ref, w3_ref, b3_ref, w4_ref, b4_ref,
    hw_ref, hb_ref, cw_ref, cb_ref,
    feat_ref, sig_ref, out_ref,
):
    B = feat_ref.shape[0]
    S = x_ref.shape[0] // B

    # ---- backbone stand-in: 1x1 conv as flat matmul + ReLU + global avg pool
    h = jnp.dot(x_ref[...], stem_w_ref[...], preferred_element_type=jnp.float32)
    h = jnp.maximum(h + stem_b_ref[...], 0.0)                     # [B*S, FEAT]
    # global average pool: reshape + sublane-axis mean (XLU slot, no pool-matrix
    # DMA, no wasted MXU MACs on a block-diagonal matrix).
    h = jnp.mean(h.reshape(B, S, h.shape[-1]), axis=1)            # [B, FEAT]

    # ---- neck: (Linear with BN(eval) folded into W'/b', then ReLU) x 4
    def neck_layer(x, w_ref, b_ref):
        y = jnp.dot(x, w_ref[...], preferred_element_type=jnp.float32)
        return jnp.maximum(y + b_ref[...], 0.0)

    h = neck_layer(h, w1_ref, b1_ref)
    h = neck_layer(h, w2_ref, b2_ref)
    h = neck_layer(h, w3_ref, b3_ref)
    h = neck_layer(h, w4_ref, b4_ref)
    feat_ref[...] = h                                             # x (neck output)

    # ---- head (Linear) + sigmoid, classifier (Linear) — xq never leaves VMEM
    xq = jnp.dot(h, hw_ref[...], preferred_element_type=jnp.float32) + hb_ref[...]
    sig_ref[...] = jax.nn.sigmoid(xq)
    out_ref[...] = jnp.dot(xq, cw_ref[...], preferred_element_type=jnp.float32) + cb_ref[...]


# ------------------------------ Pallas wrapper -------------------------------

def _full_spec(shape):
    # single whole-array block (grid = (1,))
    return pl.BlockSpec(shape, lambda *_: (0,) * len(shape))


def feature_ex_forward(params, x_nchw):
    B = x_nchw.shape[0]
    x_flat = space_to_depth_flat(x_nchw, r=4)                     # [B*S, Cin]
    # pad the contraction dim to the (already padded) stem_w row count so the
    # stem matmul K dim is lane-aligned and x loads are unmasked.
    c_in = x_flat.shape[1]
    k_pad = params["stem_w"].shape[0]
    x_flat = jnp.pad(x_flat, ((0, 0), (0, k_pad - c_in)))

    args = [x_flat, params["stem_w"], params["stem_b"]]
    for (w, b) in params["neck_folded"]:
        args += [w, b]
    args += [params["head_w"], params["head_b"],
             params["cls_w_pad"], params["cls_b_pad"]]

    f_out = params["neck_folded"][-1][0].shape[1]   # x_feat / xq width (128)
    n_pad = params["cls_w_pad"].shape[1]            # padded classifier width (128)
    num_classes = params["cls_w"].shape[1]          # true classifier width (static)

    out_shape = (
        jax.ShapeDtypeStruct((B, f_out), jnp.float32),   # x_feat
        jax.ShapeDtypeStruct((B, f_out), jnp.float32),   # sigmoid(xq)
        jax.ShapeDtypeStruct((B, n_pad), jnp.float32),   # classifier (padded)
    )

    x_feat, xq_sig, out_pad = pl.pallas_call(
        _fused_forward_kernel,
        grid=(1,),
        in_specs=[_full_spec(a.shape) for a in args],
        out_specs=tuple(_full_spec(o.shape) for o in out_shape),
        out_shape=out_shape,
        compiler_params=pltpu.CompilerParams(dimension_semantics=("arbitrary",)),
    )(*args)

    return x_feat, xq_sig, out_pad[:, :num_classes]


# ----------------------------- parameter setup ------------------------------

def _linear_init(key, fan_in, fan_out):
    # PyTorch nn.Linear default init: U(-1/sqrt(fan_in), 1/sqrt(fan_in)).
    kw, kb = jax.random.split(key)
    bound = 1.0 / float(fan_in) ** 0.5
    w = jax.random.uniform(kw, (fan_in, fan_out), jnp.float32, -bound, bound)
    b = jax.random.uniform(kb, (1, fan_out), jnp.float32, -bound, bound)
    return w, b


def init_params(key, c_in_sd, feat, num_classes):
    # Scaled-down, lane-aligned (multiples of 128) stand-ins for
    # tresnet_l feat=2432 and the 4096/2048/1024/512 neck.
    dims = [feat, 256, 256, 128, 128]
    keys = jax.random.split(key, 7)
    p = {}

    # stem ("1x1 conv" after space-to-depth): zero-pad K (rows) to a lane multiple
    stem_w, stem_b = _linear_init(keys[0], c_in_sd, feat)
    k_pad = ((c_in_sd + _LANE - 1) // _LANE) * _LANE
    p["stem_w_raw"] = stem_w
    p["stem_w"] = jnp.pad(stem_w, ((0, k_pad - c_in_sd), (0, 0)))
    p["stem_b"] = stem_b

    # neck: Linear + BatchNorm1d(eval). BN (gamma=1, beta=0, mean=0, var=1) is
    # folded into the kernel's weights: W' = W*scale, b' = b*scale + shift.
    bn_scale = 1.0 / (1.0 + _BN_EPS) ** 0.5
    p["neck"] = []         # raw (for the reference, which applies BN explicitly)
    p["neck_folded"] = []  # folded (used by the kernel)
    for li in range(4):
        w, b = _linear_init(keys[1 + li], dims[li], dims[li + 1])
        p["neck"].append((w, b))
        p["neck_folded"].append((w * bn_scale, b * bn_scale))

    p["head_w"], p["head_b"] = _linear_init(keys[5], dims[-1], dims[-1])
    cls_w, cls_b = _linear_init(keys[6], dims[-1], num_classes)
    p["cls_w"], p["cls_b"] = cls_w, cls_b
    # zero-pad classifier output dim to a lane multiple so the kernel's final
    # store is lane-dense; the wrapper slices back to num_classes.
    n_pad = max(_LANE, ((num_classes + _LANE - 1) // _LANE) * _LANE)
    p["cls_w_pad"] = jnp.pad(cls_w, ((0, 0), (0, n_pad - num_classes)))
    p["cls_b_pad"] = jnp.pad(cls_b, ((0, 0), (0, n_pad - num_classes)))
    return p


# ------------------------------- data layout ---------------------------------

def space_to_depth_flat(x_nchw, r=4):
    # NCHW -> NHWC -> [B*(H/r)*(W/r), C*r*r]   (TResNet-style stem rearrangement)
    # TODO(synk): at real H*W, fuse this into the kernel (index_map / strided DMA)
    #             instead of materializing an HBM intermediate.
    b, c, h, w = x_nchw.shape
    x = jnp.transpose(x_nchw, (0, 2, 3, 1))
    x = x.reshape(b, h // r, r, w // r, r, c)
    x = jnp.transpose(x, (0, 1, 3, 2, 4, 5))
    return x.reshape(b * (h // r) * (w // r), c * r * r)


# ------------------------- pure-JAX reference check --------------------------

def _dot_hi(a, b):
    return jnp.dot(a, b, precision=jax.lax.Precision.HIGHEST)


def feature_ex_forward_ref(params, x_nchw):
    b = x_nchw.shape[0]
    x_flat = space_to_depth_flat(x_nchw, r=4)
    h = jnp.maximum(_dot_hi(x_flat, params["stem_w_raw"]) + params["stem_b"], 0.0)
    feat = h.reshape(b, -1, h.shape[-1]).mean(axis=1)
    h = feat
    inv_std = 1.0 / jnp.sqrt(jnp.float32(1.0 + _BN_EPS))   # BN eval, default stats
    for (w, bb) in params["neck"]:
        h = jnp.maximum((_dot_hi(h, w) + bb) * inv_std, 0.0)
    x_feat = h
    xq = _dot_hi(x_feat, params["head_w"]) + params["head_b"]
    out = _dot_hi(xq, params["cls_w"]) + params["cls_b"]
    return x_feat, jax.nn.sigmoid(xq), out


# ----------------------------------- main ------------------------------------

if __name__ == "__main__":
    key = jax.random.PRNGKey(0)
    k_param, k_x = jax.random.split(key)

    # B=8 fills all 8 sublanes of every post-pool vreg / matmul row block
    # (perf review: raise effective M).
    B, C, H, W = 8, 3, 16, 16
    NUM_CLASSES = 10
    FEAT = 256                      # lane-aligned stand-in for tresnet_l's 2432 features
    C_IN_SD = C * 4 * 4             # 48 channels after space-to-depth (r=4)

    params = init_params(k_param, C_IN_SD, FEAT, NUM_CLASSES)
    x = jax.random.normal(k_x, (B, C, H, W), jnp.float32)

    fwd = jax.jit(feature_ex_forward)
    x_feat, xq_sig, out = fwd(params, x)
    jax.block_until_ready((x_feat, xq_sig, out))

    # sanity check against pure-JAX reference
    rf, rs, ro = feature_ex_forward_ref(params, x)
    assert x_feat.shape == (B, 128) and xq_sig.shape == (B, 128)
    assert out.shape == (B, NUM_CLASSES)
    assert jnp.allclose(x_feat, rf, atol=1e-4, rtol=1e-4)
    assert jnp.allclose(xq_sig, rs, atol=1e-4, rtol=1e-4)
    assert jnp.allclose(out, ro, atol=1e-4, rtol=1e-4)

    print("KERNEL_OK")
</pallas_src>

<mosaic_0001>
module attributes {stable_mosaic.version = 11 : i64} {
  func.func @_fused_forward_kernel(%arg0: i32, %arg1: memref<128x128xf32, #tpu.memory_space<vmem>>, %arg2: memref<128x256xf32, #tpu.memory_space<vmem>>, %arg3: memref<1x256xf32, #tpu.memory_space<vmem>>, %arg4: memref<256x256xf32, #tpu.memory_space<vmem>>, %arg5: memref<1x256xf32, #tpu.memory_space<vmem>>, %arg6: memref<256x256xf32, #tpu.memory_space<vmem>>, %arg7: memref<1x256xf32, #tpu.memory_space<vmem>>, %arg8: memref<256x128xf32, #tpu.memory_space<vmem>>, %arg9: memref<1x128xf32, #tpu.memory_space<vmem>>, %arg10: memref<128x128xf32, #tpu.memory_space<vmem>>, %arg11: memref<1x128xf32, #tpu.memory_space<vmem>>, %arg12: memref<128x128xf32, #tpu.memory_space<vmem>>, %arg13: memref<1x128xf32, #tpu.memory_space<vmem>>, %arg14: memref<128x128xf32, #tpu.memory_space<vmem>>, %arg15: memref<1x128xf32, #tpu.memory_space<vmem>>, %arg16: memref<8x128xf32, #tpu.memory_space<vmem>>, %arg17: memref<8x128xf32, #tpu.memory_space<vmem>>, %arg18: memref<8x128xf32, #tpu.memory_space<vmem>>) attributes {dimension_semantics = [#tpu.dimension_semantics<arbitrary>], iteration_bounds = array<i64: 1>, scalar_prefetch = 0 : i64, scratch_operands = 0 : i64, tpu.core_type = #tpu.core_type<tc>, window_params = [{pipeline_mode = #tpu.pipeline_mode<synchronous>, transform_indices = @transform_0, window_bounds = array<i64: 128, 128>}, {pipeline_mode = #tpu.pipeline_mode<synchronous>, transform_indices = @transform_1, window_bounds = array<i64: 128, 256>}, {pipeline_mode = #tpu.pipeline_mode<synchronous>, transform_indices = @transform_2, window_bounds = array<i64: 1, 256>}, {pipeline_mode = #tpu.pipeline_mode<synchronous>, transform_indices = @transform_3, window_bounds = array<i64: 256, 256>}, {pipeline_mode = #tpu.pipeline_mode<synchronous>, transform_indices = @transform_4, window_bounds = array<i64: 1, 256>}, {pipeline_mode = #tpu.pipeline_mode<synchronous>, transform_indices = @transform_5, window_bounds = array<i64: 256, 256>}, {pipeline_mode = #tpu.pipeline_mode<synchronous>, transform_indices = @transform_6, window_bounds = array<i64: 1, 256>}, {pipeline_mode = #tpu.pipeline_mode<synchronous>, transform_indices = @transform_7, window_bounds = array<i64: 256, 128>}, {pipeline_mode = #tpu.pipeline_mode<synchronous>, transform_indices = @transform_8, window_bounds = array<i64: 1, 128>}, {pipeline_mode = #tpu.pipeline_mode<synchronous>, transform_indices = @transform_9, window_bounds = array<i64: 128, 128>}, {pipeline_mode = #tpu.pipeline_mode<synchronous>, transform_indices = @transform_10, window_bounds = array<i64: 1, 128>}, {pipeline_mode = #tpu.pipeline_mode<synchronous>, transform_indices = @transform_11, window_bounds = array<i64: 128, 128>}, {pipeline_mode = #tpu.pipeline_mode<synchronous>, transform_indices = @transform_12, window_bounds = array<i64: 1, 128>}, {pipeline_mode = #tpu.pipeline_mode<synchronous>, transform_indices = @transform_13, window_bounds = array<i64: 128, 128>}, {pipeline_mode = #tpu.pipeline_mode<synchronous>, transform_indices = @transform_14, window_bounds = array<i64: 1, 128>}, {pipeline_mode = #tpu.pipeline_mode<synchronous>, transform_indices = @transform_15, window_bounds = array<i64: 8, 128>}, {pipeline_mode = #tpu.pipeline_mode<synchronous>, transform_indices = @transform_16, window_bounds = array<i64: 8, 128>}, {pipeline_mode = #tpu.pipeline_mode<synchronous>, transform_indices = @transform_17, window_bounds = array<i64: 8, 128>}]} {
    %c0 = arith.constant 0 : index
    %c0_0 = arith.constant 0 : index
    %0 = vector.load %arg1[%c0, %c0_0] : memref<128x128xf32, #tpu.memory_space<vmem>>, vector<128x128xf32>
    %c0_1 = arith.constant 0 : index
    %c0_2 = arith.constant 0 : index
    %1 = vector.load %arg2[%c0_1, %c0_2] : memref<128x256xf32, #tpu.memory_space<vmem>>, vector<128x256xf32>
    %cst = arith.constant dense<0.000000e+00> : vector<128x256xf32>
    %2 = tpu.matmul %0, %1, %cst {dimension_numbers = #tpu.dot_dimension_numbers<[1], [0], [0], [1], [0, 0, 1, 1], [], []>} : vector<128x128xf32>, vector<128x256xf32>, vector<128x256xf32> -> vector<128x256xf32>
    %c0_3 = arith.constant 0 : index
    %c0_4 = arith.constant 0 : index
    %3 = vector.load %arg3[%c0_3, %c0_4] : memref<1x256xf32, #tpu.memory_space<vmem>>, vector<1x256xf32>
    %4 = vector.broadcast %3 : vector<1x256xf32> to vector<128x256xf32>
    %5 = arith.addf %2, %4 : vector<128x256xf32>
    %cst_5 = arith.constant 0.000000e+00 : f32
    %6 = vector.broadcast %cst_5 : f32 to vector<128x256xf32>
    %7 = arith.maximumf %5, %6 : vector<128x256xf32>
    %8 = vector.shape_cast %7 : vector<128x256xf32> to vector<8x16x256xf32>
    %cst_6 = arith.constant dense<0.000000e+00> : vector<8x256xf32>
    %9 = vector.multi_reduction <add>, %8, %cst_6 [1] : vector<8x16x256xf32> to vector<8x256xf32>
    %cst_7 = arith.constant 1.600000e+01 : f32
    %10 = vector.broadcast %cst_7 : f32 to vector<8x256xf32>
    %11 = arith.divf %9, %10 : vector<8x256xf32>
    %c0_8 = arith.constant 0 : index
    %c0_9 = arith.constant 0 : index
    %12 = vector.load %arg4[%c0_8, %c0_9] : memref<256x256xf32, #tpu.memory_space<vmem>>, vector<256x256xf32>
    %cst_10 = arith.constant dense<0.000000e+00> : vector<8x256xf32>
    %13 = tpu.matmul %11, %12, %cst_10 {dimension_numbers = #tpu.dot_dimension_numbers<[1], [0], [0], [1], [0, 0, 1, 1], [], []>} : vector<8x256xf32>, vector<256x256xf32>, vector<8x256xf32> -> vector<8x256xf32>
    %c0_11 = arith.constant 0 : index
    %c0_12 = arith.constant 0 : index
    %14 = vector.load %arg5[%c0_11, %c0_12] : memref<1x256xf32, #tpu.memory_space<vmem>>, vector<1x256xf32>
    %15 = vector.broadcast %14 : vector<1x256xf32> to vector<8x256xf32>
    %16 = arith.addf %13, %15 : vector<8x256xf32>
    %cst_13 = arith.constant 0.000000e+00 : f32
    %17 = vector.broadcast %cst_13 : f32 to vector<8x256xf32>
    %18 = arith.maximumf %16, %17 : vector<8x256xf32>
    %c0_14 = arith.constant 0 : index
    %c0_15 = arith.constant 0 : index
    %19 = vector.load %arg6[%c0_14, %c0_15] : memref<256x256xf32, #tpu.memory_space<vmem>>, vector<256x256xf32>
    %cst_16 = arith.constant dense<0.000000e+00> : vector<8x256xf32>
    %20 = tpu.matmul %18, %19, %cst_16 {dimension_numbers = #tpu.dot_dimension_numbers<[1], [0], [0], [1], [0, 0, 1, 1], [], []>} : vector<8x256xf32>, vector<256x256xf32>, vector<8x256xf32> -> vector<8x256xf32>
    %c0_17 = arith.constant 0 : index
    %c0_18 = arith.constant 0 : index
    %21 = vector.load %arg7[%c0_17, %c0_18] : memref<1x256xf32, #tpu.memory_space<vmem>>, vector<1x256xf32>
    %22 = vector.broadcast %21 : vector<1x256xf32> to vector<8x256xf32>
    %23 = arith.addf %20, %22 : vector<8x256xf32>
    %cst_19 = arith.constant 0.000000e+00 : f32
    %24 = vector.broadcast %cst_19 : f32 to vector<8x256xf32>
    %25 = arith.maximumf %23, %24 : vector<8x256xf32>
    %c0_20 = arith.constant 0 : index
    %c0_21 = arith.constant 0 : index
    %26 = vector.load %arg8[%c0_20, %c0_21] : memref<256x128xf32, #tpu.memory_space<vmem>>, vector<256x128xf32>
    %cst_22 = arith.constant dense<0.000000e+00> : vector<8x128xf32>
    %27 = tpu.matmul %25, %26, %cst_22 {dimension_numbers = #tpu.dot_dimension_numbers<[1], [0], [0], [1], [0, 0, 1, 1], [], []>} : vector<8x256xf32>, vector<256x128xf32>, vector<8x128xf32> -> vector<8x128xf32>
    %c0_23 = arith.constant 0 : index
    %c0_24 = arith.constant 0 : index
    %28 = vector.load %arg9[%c0_23, %c0_24] : memref<1x128xf32, #tpu.memory_space<vmem>>, vector<1x128xf32>
    %29 = vector.broadcast %28 : vector<1x128xf32> to vector<8x128xf32>
    %30 = arith.addf %27, %29 : vector<8x128xf32>
    %cst_25 = arith.constant 0.000000e+00 : f32
    %31 = vector.broadcast %cst_25 : f32 to vector<8x128xf32>
    %32 = arith.maximumf %30, %31 : vector<8x128xf32>
    %c0_26 = arith.constant 0 : index
    %c0_27 = arith.constant 0 : index
    %33 = vector.load %arg10[%c0_26, %c0_27] : memref<128x128xf32, #tpu.memory_space<vmem>>, vector<128x128xf32>
    %cst_28 = arith.constant dense<0.000000e+00> : vector<8x128xf32>
    %34 = tpu.matmul %32, %33, %cst_28 {dimension_numbers = #tpu.dot_dimension_numbers<[1], [0], [0], [1], [0, 0, 1, 1], [], []>} : vector<8x128xf32>, vector<128x128xf32>, vector<8x128xf32> -> vector<8x128xf32>
    %c0_29 = arith.constant 0 : index
    %c0_30 = arith.constant 0 : index
    %35 = vector.load %arg11[%c0_29, %c0_30] : memref<1x128xf32, #tpu.memory_space<vmem>>, vector<1x128xf32>
    %36 = vector.broadcast %35 : vector<1x128xf32> to vector<8x128xf32>
    %37 = arith.addf %34, %36 : vector<8x128xf32>
    %cst_31 = arith.constant 0.000000e+00 : f32
    %38 = vector.broadcast %cst_31 : f32 to vector<8x128xf32>
    %39 = arith.maximumf %37, %38 : vector<8x128xf32>
    %c0_32 = arith.constant 0 : index
    %c0_33 = arith.constant 0 : index
    %40 = vector.load %arg16[%c0_32, %c0_33] : memref<8x128xf32, #tpu.memory_space<vmem>>, vector<8x128xf32>
    tpu.vector_store %arg16[%c0_32, %c0_33], %39 {strides = array<i32>} : memref<8x128xf32, #tpu.memory_space<vmem>>, vector<8x128xf32>,
    %c0_34 = arith.constant 0 : index
    %c0_35 = arith.constant 0 : index
    %41 = vector.load %arg12[%c0_34, %c0_35] : memref<128x128xf32, #tpu.memory_space<vmem>>, vector<128x128xf32>
    %cst_36 = arith.constant dense<0.000000e+00> : vector<8x128xf32>
    %42 = tpu.matmul %39, %41, %cst_36 {dimension_numbers = #tpu.dot_dimension_numbers<[1], [0], [0], [1], [0, 0, 1, 1], [], []>} : vector<8x128xf32>, vector<128x128xf32>, vector<8x128xf32> -> vector<8x128xf32>
    %c0_37 = arith.constant 0 : index
    %c0_38 = arith.constant 0 : index
    %43 = vector.load %arg13[%c0_37, %c0_38] : memref<1x128xf32, #tpu.memory_space<vmem>>, vector<1x128xf32>
    %44 = vector.broadcast %43 : vector<1x128xf32> to vector<8x128xf32>
    %45 = arith.addf %42, %44 : vector<8x128xf32>
    %46 = arith.negf %45 : vector<8x128xf32>
    %47 = math.exp %46 : vector<8x128xf32>
    %cst_39 = arith.constant 1.000000e+00 : f32
    %48 = vector.broadcast %cst_39 : f32 to vector<8x128xf32>
    %49 = arith.addf %48, %47 : vector<8x128xf32>
    %50 = arith.divf %48, %49 : vector<8x128xf32>
    %c0_40 = arith.constant 0 : index
    %c0_41 = arith.constant 0 : index
    %51 = vector.load %arg17[%c0_40, %c0_41] : memref<8x128xf32, #tpu.memory_space<vmem>>, vector<8x128xf32>
    tpu.vector_store %arg17[%c0_40, %c0_41], %50 {strides = array<i32>} : memref<8x128xf32, #tpu.memory_space<vmem>>, vector<8x128xf32>,
    %c0_42 = arith.constant 0 : index
    %c0_43 = arith.constant 0 : index
    %52 = vector.load %arg14[%c0_42, %c0_43] : memref<128x128xf32, #tpu.memory_space<vmem>>, vector<128x128xf32>
    %cst_44 = arith.constant dense<0.000000e+00> : vector<8x128xf32>
    %53 = tpu.matmul %45, %52, %cst_44 {dimension_numbers = #tpu.dot_dimension_numbers<[1], [0], [0], [1], [0, 0, 1, 1], [], []>} : vector<8x128xf32>, vector<128x128xf32>, vector<8x128xf32> -> vector<8x128xf32>
    %c0_45 = arith.constant 0 : index
    %c0_46 = arith.constant 0 : index
    %54 = vector.load %arg15[%c0_45, %c0_46] : memref<1x128xf32, #tpu.memory_space<vmem>>, vector<1x128xf32>
    %55 = vector.broadcast %54 : vector<1x128xf32> to vector<8x128xf32>
    %56 = arith.addf %53, %55 : vector<8x128xf32>
    %c0_47 = arith.constant 0 : index
    %c0_48 = arith.constant 0 : index
    %57 = vector.load %arg18[%c0_47, %c0_48] : memref<8x128xf32, #tpu.memory_space<vmem>>, vector<8x128xf32>
    tpu.vector_store %arg18[%c0_47, %c0_48], %56 {strides = array<i32>} : memref<8x128xf32, #tpu.memory_space<vmem>>, vector<8x128xf32>,
    return
  }
  func.func @transform_0(%arg0: i32) -> (i32, i32) {
    %c0_i32 = arith.constant 0 : i32
    %c0_i32_0 = arith.constant 0 : i32
    %c0_i32_1 = arith.constant 0 : i32
    return %c0_i32, %c0_i32_0 : i32, i32
  }
  func.func @transform_1(%arg0: i32) -> (i32, i32) {
    %c0_i32 = arith.constant 0 : i32
    %c0_i32_0 = arith.constant 0 : i32
    %c0_i32_1 = arith.constant 0 : i32
    return %c0_i32, %c0_i32_0 : i32, i32
  }
  func.func @transform_2(%arg0: i32) -> (i32, i32) {
    %c0_i32 = arith.constant 0 : i32
    %c0_i32_0 = arith.constant 0 : i32
    %c0_i32_1 = arith.constant 0 : i32
    return %c0_i32, %c0_i32_0 : i32, i32
  }
  func.func @transform_3(%arg0: i32) -> (i32, i32) {
    %c0_i32 = arith.constant 0 : i32
    %c0_i32_0 = arith.constant 0 : i32
    %c0_i32_1 = arith.constant 0 : i32
    return %c0_i32, %c0_i32_0 : i32, i32
  }
  func.func @transform_4(%arg0: i32) -> (i32, i32) {
    %c0_i32 = arith.constant 0 : i32
    %c0_i32_0 = arith.constant 0 : i32
    %c0_i32_1 = arith.constant 0 : i32
    return %c0_i32, %c0_i32_0 : i32, i32
  }
  func.func @transform_5(%arg0: i32) -> (i32, i32) {
    %c0_i32 = arith.constant 0 : i32
    %c0_i32_0 = arith.constant 0 : i32
    %c0_i32_1 = arith.constant 0 : i32
    return %c0_i32, %c0_i32_0 : i32, i32
  }
  func.func @transform_6(%arg0: i32) -> (i32, i32) {
    %c0_i32 = arith.constant 0 : i32
    %c0_i32_0 = arith.constant 0 : i32
    %c0_i32_1 = arith.constant 0 : i32
    return %c0_i32, %c0_i32_0 : i32, i32
  }
  func.func @transform_7(%arg0: i32) -> (i32, i32) {
    %c0_i32 = arith.constant 0 : i32
    %c0_i32_0 = arith.constant 0 : i32
    %c0_i32_1 = arith.constant 0 : i32
    return %c0_i32, %c0_i32_0 : i32, i32
  }
  func.func @transform_8(%arg0: i32) -> (i32, i32) {
    %c0_i32 = arith.constant 0 : i32
    %c0_i32_0 = arith.constant 0 : i32
    %c0_i32_1 = arith.constant 0 : i32
    return %c0_i32, %c0_i32_0 : i32, i32
  }
  func.func @transform_9(%arg0: i32) -> (i32, i32) {
    %c0_i32 = arith.constant 0 : i32
    %c0_i32_0 = arith.constant 0 : i32
    %c0_i32_1 = arith.constant 0 : i32
    return %c0_i32, %c0_i32_0 : i32, i32
  }
  func.func @transform_10(%arg0: i32) -> (i32, i32) {
    %c0_i32 = arith.constant 0 : i32
    %c0_i32_0 = arith.constant 0 : i32
    %c0_i32_1 = arith.constant 0 : i32
    return %c0_i32, %c0_i32_0 : i32, i32
  }
  func.func @transform_11(%arg0: i32) -> (i32, i32) {
    %c0_i32 = arith.constant 0 : i32
    %c0_i32_0 = arith.constant 0 : i32
    %c0_i32_1 = arith.constant 0 : i32
    return %c0_i32, %c0_i32_0 : i32, i32
  }
  func.func @transform_12(%arg0: i32) -> (i32, i32) {
    %c0_i32 = arith.constant 0 : i32
    %c0_i32_0 = arith.constant 0 : i32
    %c0_i32_1 = arith.constant 0 : i32
    return %c0_i32, %c0_i32_0 : i32, i32
  }
  func.func @transform_13(%arg0: i32) -> (i32, i32) {
    %c0_i32 = arith.constant 0 : i32
    %c0_i32_0 = arith.constant 0 : i32
    %c0_i32_1 = arith.constant 0 : i32
    return %c0_i32, %c0_i32_0 : i32, i32
  }
  func.func @transform_14(%arg0: i32) -> (i32, i32) {
    %c0_i32 = arith.constant 0 : i32
    %c0_i32_0 = arith.constant 0 : i32
    %c0_i32_1 = arith.constant 0 : i32
    return %c0_i32, %c0_i32_0 : i32, i32
  }
  func.func @transform_15(%arg0: i32) -> (i32, i32) {
    %c0_i32 = arith.constant 0 : i32
    %c0_i32_0 = arith.constant 0 : i32
    %c0_i32_1 = arith.constant 0 : i32
    return %c0_i32, %c0_i32_0 : i32, i32
  }
  func.func @transform_16(%arg0: i32) -> (i32, i32) {
    %c0_i32 = arith.constant 0 : i32
    %c0_i32_0 = arith.constant 0 : i32
    %c0_i32_1 = arith.constant 0 : i32
    return %c0_i32, %c0_i32_0 : i32, i32
  }
  func.func @transform_17(%arg0: i32) -> (i32, i32) {
    %c0_i32 = arith.constant 0 : i32
    %c0_i32_0 = arith.constant 0 : i32
    %c0_i32_1 = arith.constant 0 : i32
    return %c0_i32, %c0_i32_0 : i32, i32
  }
}

</mosaic_0001>

<bundles_post_ra>
// kernel: feature_ex_forward.1
= control target key start
LH: loop header
LB: loop body
LE: loop exit
PB: predicated region body
PF: predicated region fallthrough
CT: control target
= control target key end

     0   :  { %s2073_s0 = inlined_call_operand.vmem [shape: f32[128,128], index: 0, kind: input, shape index: {}]   ;;  %s2074_s1 = inlined_call_operand.vmem [shape: f32[128,256], index: 1, kind: input, shape index: {}]   ;;  %s2075_s2 = inlined_call_operand.vmem [shape: f32[1,256], index: 2, kind: input, shape index: {}]   ;;  %s2076_s3 = inlined_call_operand.vmem [shape: f32[256,256], index: 3, kind: input, shape index: {}]   ;;  %s2077_s4 = inlined_call_operand.vmem [shape: f32[1,256], index: 4, kind: input, shape index: {}]   ;;  %s2078_s5 = inlined_call_operand.vmem [shape: f32[256,256], index: 5, kind: input, shape index: {}]   ;;  %s2079_s6 = inlined_call_operand.vmem [shape: f32[1,256], index: 6, kind: input, shape index: {}]   ;;  %s2080_s7 = inlined_call_operand.vmem [shape: f32[256,128], index: 7, kind: input, shape index: {}]   ;;  %s2081_s8 = inlined_call_operand.vmem [shape: f32[1,128], index: 8, kind: input, shape index: {}]   ;;  %s2082_s9 = inlined_call_operand.vmem [shape: f32[128,128], index: 9, kind: input, shape index: {}]   ;;  %s2083_s10 = inlined_call_operand.vmem [shape: f32[1,128], index: 10, kind: input, shape index: {}]   ;;  %s2084_s11 = inlined_call_operand.vmem [shape: f32[128,128], index: 11, kind: input, shape index: {}]   ;;  %s2085_s12 = inlined_call_operand.vmem [shape: f32[1,128], index: 12, kind: input, shape index: {}]   ;;  %s2086_s13 = inlined_call_operand.vmem [shape: f32[128,128], index: 13, kind: input, shape index: {}]   ;;  %s2087_s14 = inlined_call_operand.vmem [shape: f32[1,128], index: 14, kind: input, shape index: {}]   ;;  %s2088_s15 = inlined_call_operand.hbm [shape: f32[8,128], index: 15, kind: output, shape index: {0}]   ;;  %s2089_s16 = inlined_call_operand.hbm [shape: f32[8,128], index: 16, kind: output, shape index: {1}]   ;;  %s2090_s17 = inlined_call_operand.hbm [shape: f32[8,128], index: 17, kind: output, shape index: {2}]  }
   0x1   :  { %2093 = sst [smem:[#allocation9_spill]] %s2073_s0 }
   0x2   :  { %2094 = sst [smem:[#allocation10_spill]] %s2074_s1 }
   0x3   :  { %23 = vsyncpa [#allocation3], 0  ;;  %s2095_s26 = sld [smem:[#allocation10_spill]] }
   0x9   :  { %v101_v0 = vld [vmem:[%s2095_s26 + $0xf0] sm:$0xff]  ;;  %v102_v1 = vld [vmem:[%s2095_s26 + $0xf8] sm:$0xff]  ;;  %v99_v2 = vld [vmem:[%s2095_s26 + $0xe0] sm:$0xff] }
   0xa   :  { %109 = vmatpush.msra.mxu0 %v101_v0  ;;  %174 = vmatpush.msra.mxu1 %v102_v1  ;;  %v100_v3 = vld [vmem:[%s2095_s26 + $0xe8] sm:$0xff]  ;;  %v97_v4 = vld [vmem:[%s2095_s26 + $0xd0] sm:$0xff]  ;;  %v98_v5 = vld [vmem:[%s2095_s26 + $0xd8] sm:$0xff] }
   0xb   :  { %v95_v6 = vld [vmem:[%s2095_s26 + $0xc0] sm:$0xff]  ;;  %v96_v7 = vld [vmem:[%s2095_s26 + $0xc8] sm:$0xff]  ;;  %v93_v8 = vld [vmem:[%s2095_s26 + $0xb0] sm:$0xff] }
   0xc   :  { %110 = vmatpush.msra.mxu0 %v99_v2  ;;  %175 = vmatpush.msra.mxu1 %v100_v3  ;;  %v94_v9 = vld [vmem:[%s2095_s26 + $0xb8] sm:$0xff]  ;;  %v91_v10 = vld [vmem:[%s2095_s26 + $0xa0] sm:$0xff]  ;;  %v92_v11 = vld [vmem:[%s2095_s26 + $0xa8] sm:$0xff] }
   0xd   :  { %v89_v12 = vld [vmem:[%s2095_s26 + $0x90] sm:$0xff]  ;;  %v90_v13 = vld [vmem:[%s2095_s26 + $0x98] sm:$0xff]  ;;  %v87_v14 = vld [vmem:[%s2095_s26 + $0x80] sm:$0xff] }
   0xe   :  { %111 = vmatpush.msra.mxu0 %v97_v4  ;;  %176 = vmatpush.msra.mxu1 %v98_v5  ;;  %v88_v15 = vld [vmem:[%s2095_s26 + $0x88] sm:$0xff] }
  0x10   :  { %112 = vmatpush.msra.mxu0 %v95_v6  ;;  %177 = vmatpush.msra.mxu1 %v96_v7 }
  0x12   :  { %113 = vmatpush.msra.mxu0 %v93_v8  ;;  %178 = vmatpush.msra.mxu1 %v94_v9 }
  0x14   :  { %114 = vmatpush.msra.mxu0 %v91_v10  ;;  %179 = vmatpush.msra.mxu1 %v92_v11 }
  0x16   :  { %115 = vmatpush.msra.mxu0 %v89_v12  ;;  %180 = vmatpush.msra.mxu1 %v90_v13 }
  0x17   :  { %24 = vsyncpa [#allocation5], 0  ;;  %v85_v16 = vld [vmem:[%s2095_s26 + $0x70] sm:$0xff]  ;;  %v86_v17 = vld [vmem:[%s2095_s26 + $0x78] sm:$0xff]  ;;  %s2096_s20 = sld [smem:[#allocation9_spill]]  ;;  %v1107_v0 = vmov 16.0  }
  0x18   :  { %116 = vmatpush.msra.mxu0 %v87_v14  ;;  %181 = vmatpush.msra.mxu1 %v88_v15  ;;  %v83_v18 = vld [vmem:[%s2095_s26 + $0x60] sm:$0xff]  ;;  %v84_v19 = vld [vmem:[%s2095_s26 + $0x68] sm:$0xff]  ;;  %v81_v20 = vld [vmem:[%s2095_s26 + $0x50] sm:$0xff]  ;;  %1025 = vrcp.f32 %v1107_v0  ;;  %vm492_vm1 = vcmask 1041409   ;;  %vm494_vm2 = vcmask 1042434   ;;  %vm496_vm3 = vcmask 1043459  }
  0x19   :  { %v82_v21 = vld [vmem:[%s2095_s26 + $0x58] sm:$0xff]  ;;  %v79_v22 = vld [vmem:[%s2095_s26 + $0x40] sm:$0xff]  ;;  %v80_v23 = vld [vmem:[%s2095_s26 + $0x48] sm:$0xff]  ;;  %vm498_vm4 = vcmask 1044484   ;;  %vm500_vm5 = vcmask 1045509   ;;  %vm502_vm6 = vcmask 1046534  }
  0x1a   :  { %117 = vmatpush.msra.mxu0 %v85_v16  ;;  %182 = vmatpush.msra.mxu1 %v86_v17  ;;  %v77_v24 = vld [vmem:[%s2095_s26 + $0x30] sm:$0xff]  ;;  %v78_v25 = vld [vmem:[%s2095_s26 + $0x38] sm:$0xff]  ;;  %v75_v26 = vld [vmem:[%s2095_s26 + $0x20] sm:$0xff]  ;;  %vm504_vm7 = vcmask 1047559   ;;  %s1108_s21 = smov [#allocation2]   ;;  %s987_s24 = sshll.u32 %s2089_s16, 4  ;;  %s988_s24 = int_to_ptr.hbm [resolvable:$true] %s987_s24 }
  0x1b   :  { %v76_v27 = vld [vmem:[%s2095_s26 + $0x28] sm:$0xff]  ;;  %v73_v28 = vld [vmem:[%s2095_s26 + $0x10] sm:$0xff]  ;;  %v74_v29 = vld [vmem:[%s2095_s26 + $0x18] sm:$0xff]  ;;  %s974_s22 = sshll.u32 %s1108_s21, 4  ;;  %s998_s16 = sshll.u32 %s2090_s17, 4  ;;  %s975_s22 = int_to_ptr.vmem [resolvable:$true] %s974_s22  ;;  %s999_s16 = int_to_ptr.hbm [resolvable:$true] %s998_s16 }
  0x1c   :  { %118 = vmatpush.msra.mxu0 %v83_v18  ;;  %183 = vmatpush.msra.mxu1 %v84_v19  ;;  %v71_v30 = vld [vmem:[%s2095_s26] sm:$0xff]  ;;  %v72_v31 = vld [vmem:[%s2095_s26 + $0x8] sm:$0xff] }
  0x1d   :  { %v55_v32 = vld [vmem:[%s2096_s20] sm:$0xff]  ;;  %v56_v33 = vld [vmem:[%s2096_s20 + $0x8] sm:$0xff]  ;;  %v57_v34 = vld [vmem:[%s2096_s20 + $0x10] sm:$0xff] }
  0x1e   :  { %119 = vmatpush.msra.mxu0 %v81_v20  ;;  %184 = vmatpush.msra.mxu1 %v82_v21  ;;  %v58_v35 = vld [vmem:[%s2096_s20 + $0x18] sm:$0xff]  ;;  %v59_v36 = vld [vmem:[%s2096_s20 + $0x20] sm:$0xff]  ;;  %v60_v37 = vld [vmem:[%s2096_s20 + $0x28] sm:$0xff]  ;;  %v1026_v6 = vpop.eup %1025 }
  0x1f   :  { %v61_v38 = vld [vmem:[%s2096_s20 + $0x30] sm:$0xff]  ;;  %v62_v39 = vld [vmem:[%s2096_s20 + $0x38] sm:$0xff]  ;;  %v63_v40 = vld [vmem:[%s2096_s20 + $0x40] sm:$0xff]  ;;  %v384_v8 = vmul.f32 16.0, %v1026_v6  ;;  %vm388_vm0 = vweird.f32 %v1026_v6 }
  0x20   :  { %120 = vmatpush.msra.mxu0 %v79_v22  ;;  %185 = vmatpush.msra.mxu1 %v80_v23  ;;  %v64_v41 = vld [vmem:[%s2096_s20 + $0x48] sm:$0xff]  ;;  %v65_v42 = vld [vmem:[%s2096_s20 + $0x50] sm:$0xff]  ;;  %v66_v43 = vld [vmem:[%s2096_s20 + $0x58] sm:$0xff] }
  0x21   :  { %v67_v44 = vld [vmem:[%s2096_s20 + $0x60] sm:$0xff]  ;;  %v68_v45 = vld [vmem:[%s2096_s20 + $0x68] sm:$0xff]  ;;  %v69_v46 = vld [vmem:[%s2096_s20 + $0x70] sm:$0xff]  ;;  %v385_v17 = vsub.f32 1.0, %v384_v8 }
  0x22   :  { %121 = vmatpush.msra.mxu0 %v77_v24  ;;  %186 = vmatpush.msra.mxu1 %v78_v25  ;;  %v70_v47 = vld [vmem:[%s2096_s20 + $0x78] sm:$0xff]  ;;  %v103_v48 = vld [vmem:[%s2075_s2] sm:$0x3] }
  0x23   :  { %v1348_v51 = vperm.slane %v103_v48, 0  ;;  %v1350_v52 = vperm.slane %v103_v48, 1 }
  0x24   :  { %122 = vmatpush.msra.mxu0 %v75_v26  ;;  %187 = vmatpush.msra.mxu1 %v76_v27  ;;  %v386_v27 = vmul.f32 %v1026_v6, %v385_v17 }
  0x26   :  { %123 = vmatpush.msra.mxu0 %v73_v28  ;;  %188 = vmatpush.msra.mxu1 %v74_v29 }
  0x28   :  { %124 = vmatpush.msra.mxu0 %v71_v30  ;;  %189 = vmatpush.msra.mxu1 %v72_v31 }
  0x29   :  { %125 = vmatmul.f32.vlgmr.msra.gmra.mxu0 %v55_v32  ;;  %190 = vmatmul.f32.vlgmr.msra.gmra.mxu1 %v55_v32 }
  0x31   :  { %128 = vmatmul.f32.gmra.mxu0 %v56_v33  ;;  %193 = vmatmul.f32.gmra.mxu1 %v56_v33 }
  0x39   :  { %131 = vmatmul.f32.gmra.mxu0 %v57_v34  ;;  %196 = vmatmul.f32.gmra.mxu1 %v57_v34 }
  0x41   :  { %134 = vmatmul.f32.gmra.mxu0 %v58_v35  ;;  %199 = vmatmul.f32.gmra.mxu1 %v58_v35 }
  0x49   :  { %137 = vmatmul.f32.gmra.mxu0 %v59_v36  ;;  %202 = vmatmul.f32.gmra.mxu1 %v59_v36  ;;  %v387_v36 = vadd.f32 %v1026_v6, %v386_v27  ;;  %v466_v27 = vld [vmem:[%s2076_s3 + $0x1e0] sm:$0xff] }
  0x51   :  { %140 = vmatmul.f32.gmra.mxu0 %v60_v37  ;;  %205 = vmatmul.f32.gmra.mxu1 %v60_v37 }
  0x59   :  { %143 = vmatmul.f32.gmra.mxu0 %v61_v38  ;;  %208 = vmatmul.f32.gmra.mxu1 %v61_v38 }
  0x61   :  { %146 = vmatmul.f32.gmra.mxu0 %v62_v39  ;;  %211 = vmatmul.f32.gmra.mxu1 %v62_v39 }
  0x69   :  { %149 = vmatmul.f32.gmra.mxu0 %v63_v40  ;;  %214 = vmatmul.f32.gmra.mxu1 %v63_v40 }
  0x71   :  { %152 = vmatmul.f32.gmra.mxu0 %v64_v41  ;;  %217 = vmatmul.f32.gmra.mxu1 %v64_v41 }
  0x79   :  { %155 = vmatmul.f32.gmra.mxu0 %v65_v42  ;;  %220 = vmatmul.f32.gmra.mxu1 %v65_v42 }
  0x81   :  { %158 = vmatmul.f32.gmra.mxu0 %v66_v43  ;;  %223 = vmatmul.f32.gmra.mxu1 %v66_v43 }
  0x89   :  { %161 = vmatmul.f32.gmra.mxu0 %v67_v44  ;;  %226 = vmatmul.f32.gmra.mxu1 %v67_v44 }
  0x91   :  { %164 = vmatmul.f32.gmra.mxu0 %v68_v45  ;;  %229 = vmatmul.f32.gmra.mxu1 %v68_v45  ;;  %v1362_v45 = vsel %vm388_vm0, %v1026_v6, %v387_v36 }
  0x99   :  { %167 = vmatmul.f32.gmra.mxu0 %v69_v46  ;;  %232 = vmatmul.f32.gmra.mxu1 %v69_v46 }
  0xa1   :  { %170 = vmatmul.f32.gmra.mxu0 %v70_v47  ;;  %235 = vmatmul.f32.gmra.mxu1 %v70_v47 }
  0xa6   :  { %v126_v49 = vpop.f32.mrf.mxu0  ;;  %v191_v50 = vpop.f32.mrf.mxu1 }
  0xa7   :  { %v127_v53 = vadd.f32 %v126_v49, %v1348_v51  ;;  %v192_v54 = vadd.f32 %v191_v50, %v1350_v52 }
  0xa9   :  { %v239_v59 = vmax.f32 %v127_v53, 0.0  ;;  %v240_v60 = vmax.f32 %v192_v54, 0.0 }
  0xae   :  { %v129_v55 = vpop.f32.mrf.mxu0  ;;  %v194_v56 = vpop.f32.mrf.mxu1 }
  0xaf   :  { %v130_v57 = vadd.f32 %v129_v55, %v1348_v51  ;;  %v195_v58 = vadd.f32 %v194_v56, %v1350_v52 }
  0xb1   :  { %v241_v61 = vmax.f32 %v130_v57, 0.0  ;;  %v242_v62 = vmax.f32 %v195_v58, 0.0 }
  0xb3   :  { %v271_v63 = vadd.f32 %v241_v61, %v239_v59  ;;  %v278_v1 = vadd.f32 %v242_v62, %v240_v60 }
  0xb5   :  { %v272_v4 = vrot.slane %v271_v63, 4  ;;  %v279_v5 = vrot.slane %v278_v1, 4 }
  0xb6   :  { %v132_v2 = vpop.f32.mrf.mxu0  ;;  %v197_v3 = vpop.f32.mrf.mxu1 }
  0xb7   :  { %v273_v7 = vadd.f32 %v272_v4, %v271_v63  ;;  %v280_v9 = vadd.f32 %v279_v5, %v278_v1  ;;  %v133_v10 = vadd.f32 %v132_v2, %v1348_v51  ;;  %v198_v11 = vadd.f32 %v197_v3, %v1350_v52 }
  0xb9   :  { %v274_v16 = vrot.slane %v273_v7, 2  ;;  %v281_v18 = vrot.slane %v280_v9, 2  ;;  %v243_v19 = vmax.f32 %v133_v10, 0.0  ;;  %v244_v20 = vmax.f32 %v198_v11, 0.0 }
  0xbb   :  { %v275_v25 = vadd.f32 %v274_v16, %v273_v7  ;;  %v282_v26 = vadd.f32 %v281_v18, %v280_v9  ;;  %v436_v18 = vld [vmem:[%s2076_s3 + $0xf0] sm:$0xff] }
  0xbc   :  { %515 = vmatpush.msra.mxu2 %v436_v18  ;;  %v444_v18 = vld [vmem:[%s2076_s3 + $0x130] sm:$0xff] }
  0xbd   :  { %v276_v34 = vrot.slane %v275_v25, 1  ;;  %v283_v35 = vrot.slane %v282_v26, 1 }
  0xbe   :  { %v135_v12 = vpop.f32.mrf.mxu0  ;;  %v200_v13 = vpop.f32.mrf.mxu1 }
  0xbf   :  { %v136_v14 = vadd.f32 %v135_v12, %v1348_v51  ;;  %v201_v15 = vadd.f32 %v200_v13, %v1350_v52  ;;  %v277_v41 = vadd.f32 %v276_v34, %v275_v25  ;;  %v284_v42 = vadd.f32 %v283_v35, %v282_v26  ;;  %v434_v26 = vld [vmem:[%s2076_s3 + $0xe0] sm:$0xff]  ;;  %v432_v34 = vld [vmem:[%s2076_s3 + $0xd0] sm:$0xff] }
  0xc0   :  { %516 = vmatpush.msra.mxu2 %v434_v26  ;;  %v464_v35 = vld [vmem:[%s2076_s3 + $0x1d0] sm:$0xff]  ;;  %v438_v26 = vld [vmem:[%s2076_s3 + $0x100] sm:$0xff] }
  0xc1   :  { %v245_v21 = vmax.f32 %v136_v14, 0.0  ;;  %v246_v22 = vmax.f32 %v201_v15, 0.0  ;;  %v390_v56 = vmul.f32 %v1362_v45, %v277_v41  ;;  %v391_v57 = vmul.f32 %v1362_v45, %v284_v42 }
  0xc2   :  { %517 = vmatpush.msra.mxu2 %v432_v34  ;;  %v465_v34 = vld [vmem:[%s2076_s3 + $0x1d8] sm:$0xff] }
  0xc3   :  { %v285_v23 = vadd.f32 %v245_v21, %v243_v19  ;;  %v292_v24 = vadd.f32 %v246_v22, %v244_v20  ;;  %v468_v19 = vld [vmem:[%s2076_s3 + $0x1f0] sm:$0xff] }
  0xc4   :  { %535 = vmatpush.msra.mxu3 %v468_v19 }
  0xc5   :  { %v286_v28 = vrot.slane %v285_v23, 4  ;;  %v293_v29 = vrot.slane %v292_v24, 4 }
  0xc6   :  { %v138_v30 = vpop.f32.mrf.mxu0  ;;  %v203_v31 = vpop.f32.mrf.mxu1  ;;  %536 = vmatpush.msra.mxu3 %v466_v27  ;;  %v437_v27 = vld [vmem:[%s2076_s3 + $0xf8] sm:$0xff] }
  0xc7   :  { %v287_v32 = vadd.f32 %v286_v28, %v285_v23  ;;  %v294_v33 = vadd.f32 %v293_v29, %v292_v24  ;;  %v139_v43 = vadd.f32 %v138_v30, %v1348_v51  ;;  %v204_v44 = vadd.f32 %v203_v31, %v1350_v52 }
  0xc8   :  { %537 = vmatpush.msra.mxu3 %v464_v35  ;;  %v431_v35 = vld [vmem:[%s2076_s3 + $0xc8] sm:$0xff] }
  0xc9   :  { %v288_v37 = vrot.slane %v287_v32, 2  ;;  %v295_v38 = vrot.slane %v294_v33, 2  ;;  %v247_v58 = vmax.f32 %v139_v43, 0.0  ;;  %v248_v59 = vmax.f32 %v204_v44, 0.0  ;;  %v428_v44 = vld [vmem:[%s2076_s3 + $0xb0] sm:$0xff] }
  0xcb   :  { %v289_v39 = vadd.f32 %v288_v37, %v287_v32  ;;  %v296_v40 = vadd.f32 %v295_v38, %v294_v33  ;;  %v430_v38 = vld [vmem:[%s2076_s3 + $0xc0] sm:$0xff] }
  0xcc   :  { %518 = vmatpush.msra.mxu2 %v430_v38  ;;  %v461_v38 = vld [vmem:[%s2076_s3 + $0x1b8] sm:$0xff] }
  0xcd   :  { %v290_v46 = vrot.slane %v289_v39, 1  ;;  %v297_v47 = vrot.slane %v296_v40, 1 }
  0xce   :  { %v141_v48 = vpop.f32.mrf.mxu0  ;;  %v206_v49 = vpop.f32.mrf.mxu1  ;;  %519 = vmatpush.msra.mxu2 %v428_v44 }
  0xcf   :  { %v291_v50 = vadd.f32 %v290_v46, %v289_v39  ;;  %v298_v53 = vadd.f32 %v297_v47, %v296_v40  ;;  %v142_v54 = vadd.f32 %v141_v48, %v1348_v51  ;;  %v207_v55 = vadd.f32 %v206_v49, %v1350_v52  ;;  %v462_v39 = vld [vmem:[%s2076_s3 + $0x1c0] sm:$0xff]  ;;  %v460_v46 = vld [vmem:[%s2076_s3 + $0x1b0] sm:$0xff] }
  0xd0   :  { %538 = vmatpush.msra.mxu3 %v462_v39 }
  0xd1   :  { %v392_v60 = vmul.f32 %v1362_v45, %v291_v50  ;;  %v393_v61 = vmul.f32 %v1362_v45, %v298_v53  ;;  %v249_v62 = vmax.f32 %v142_v54, 0.0  ;;  %v250_v63 = vmax.f32 %v207_v55, 0.0  ;;  %v426_v53 = vld [vmem:[%s2076_s3 + $0xa0] sm:$0xff] }
  0xd2   :  { %539 = vmatpush.msra.mxu3 %v460_v46  ;;  %v458_v54 = vld [vmem:[%s2076_s3 + $0x1a0] sm:$0xff]  ;;  %520 = vmatpush.msra.mxu2 %v426_v53  ;;  %v457_v53 = vld [vmem:[%s2076_s3 + $0x198] sm:$0xff] }
  0xd3   :  { %v299_v0 = vadd.f32 %v249_v62, %v247_v58  ;;  %v306_v1 = vadd.f32 %v250_v63, %v248_v59  ;;  %v493_v2 = vsel %vm492_vm1, %v392_v60, %v390_v56  ;;  %v506_v3 = vsel %vm492_vm1, %v393_v61, %v391_v57  ;;  %v424_v57 = vld [vmem:[%s2076_s3 + $0x90] sm:$0xff]  ;;  %v422_v61 = vld [vmem:[%s2076_s3 + $0x80] sm:$0xff] }
  0xd4   :  { %540 = vmatpush.msra.mxu3 %v458_v54  ;;  %v456_v58 = vld [vmem:[%s2076_s3 + $0x190] sm:$0xff]  ;;  %521 = vmatpush.msra.mxu2 %v424_v57  ;;  %v454_v62 = vld [vmem:[%s2076_s3 + $0x180] sm:$0xff] }
  0xd5   :  { %v300_v4 = vrot.slane %v299_v0, 4  ;;  %v307_v5 = vrot.slane %v306_v1, 4 }
  0xd6   :  { %v144_v6 = vpop.f32.mrf.mxu0  ;;  %v209_v7 = vpop.f32.mrf.mxu1  ;;  %541 = vmatpush.msra.mxu3 %v456_v58  ;;  %522 = vmatpush.msra.mxu2 %v422_v61  ;;  %v423_v58 = vld [vmem:[%s2076_s3 + $0x88] sm:$0xff] }
  0xd7   :  { %v301_v8 = vadd.f32 %v300_v4, %v299_v0  ;;  %v308_v9 = vadd.f32 %v307_v5, %v306_v1  ;;  %v145_v14 = vadd.f32 %v144_v6, %v1348_v51  ;;  %v210_v15 = vadd.f32 %v209_v7, %v1350_v52  ;;  %v420_v1 = vld [vmem:[%s2076_s3 + $0x70] sm:$0xff]  ;;  %v418_v7 = vld [vmem:[%s2076_s3 + $0x60] sm:$0xff] }
  0xd8   :  { %542 = vmatpush.msra.mxu3 %v454_v62  ;;  %523 = vmatpush.msra.mxu2 %v420_v1 }
  0xd9   :  { %v302_v10 = vrot.slane %v301_v8, 2  ;;  %v309_v11 = vrot.slane %v308_v9, 2  ;;  %v251_v28 = vmax.f32 %v145_v14, 0.0  ;;  %v252_v29 = vmax.f32 %v210_v15, 0.0  ;;  %v446_v14 = vld [vmem:[%s2076_s3 + $0x140] sm:$0xff] }
  0xda   :  { %524 = vmatpush.msra.mxu2 %v418_v7 }
  0xdb   :  { %v303_v12 = vadd.f32 %v302_v10, %v301_v8  ;;  %v310_v13 = vadd.f32 %v309_v11, %v308_v9  ;;  %v450_v8 = vld [vmem:[%s2076_s3 + $0x160] sm:$0xff]  ;;  %v416_v11 = vld [vmem:[%s2076_s3 + $0x50] sm:$0xff] }
  0xdc   :  { %525 = vmatpush.msra.mxu2 %v416_v11 }
  0xdd   :  { %v304_v16 = vrot.slane %v303_v12, 1  ;;  %v311_v17 = vrot.slane %v310_v13, 1 }
  0xde   :  { %v147_v20 = vpop.f32.mrf.mxu0  ;;  %v212_v21 = vpop.f32.mrf.mxu1 }
  0xdf   :  { %v305_v22 = vadd.f32 %v304_v16, %v303_v12  ;;  %v312_v23 = vadd.f32 %v311_v17, %v310_v13  ;;  %v148_v24 = vadd.f32 %v147_v20, %v1348_v51  ;;  %v213_v25 = vadd.f32 %v212_v21, %v1350_v52  ;;  %v448_v12 = vld [vmem:[%s2076_s3 + $0x150] sm:$0xff]  ;;  %v414_v13 = vld [vmem:[%s2076_s3 + $0x40] sm:$0xff] }
  0xe0   :  { %526 = vmatpush.msra.mxu2 %v414_v13  ;;  %v412_v17 = vld [vmem:[%s2076_s3 + $0x30] sm:$0xff]  ;;  %v410_v21 = vld [vmem:[%s2076_s3 + $0x20] sm:$0xff] }
  0xe1   :  { %v394_v30 = vmul.f32 %v1362_v45, %v305_v22  ;;  %v395_v31 = vmul.f32 %v1362_v45, %v312_v23  ;;  %v253_v32 = vmax.f32 %v148_v24, 0.0  ;;  %v254_v33 = vmax.f32 %v213_v25, 0.0  ;;  %v442_v22 = vld [vmem:[%s2076_s3 + $0x120] sm:$0xff]  ;;  %v408_v23 = vld [vmem:[%s2076_s3 + $0x10] sm:$0xff] }
  0xe2   :  { %527 = vmatpush.msra.mxu2 %v412_v17  ;;  %v440_v24 = vld [vmem:[%s2076_s3 + $0x110] sm:$0xff]  ;;  %v406_v25 = vld [vmem:[%s2076_s3] sm:$0xff] }
  0xe3   :  { %v313_v36 = vadd.f32 %v253_v32, %v251_v28  ;;  %v320_v37 = vadd.f32 %v254_v33, %v252_v29  ;;  %v495_v40 = vsel %vm494_vm2, %v394_v30, %v493_v2  ;;  %v507_v41 = vsel %vm494_vm2, %v395_v31, %v506_v3  ;;  %v452_v2 = vld [vmem:[%s2076_s3 + $0x170] sm:$0xff]  ;;  %v469_v28 = vld [vmem:[%s2076_s3 + $0x1f8] sm:$0xff]  ;;  %v435_v31 = vld [vmem:[%s2076_s3 + $0xe8] sm:$0xff] }
  0xe4   :  { %543 = vmatpush.msra.mxu3 %v452_v2  ;;  %528 = vmatpush.msra.mxu2 %v410_v21  ;;  %v467_v32 = vld [vmem:[%s2076_s3 + $0x1e8] sm:$0xff]  ;;  %v433_v33 = vld [vmem:[%s2076_s3 + $0xd8] sm:$0xff] }
  0xe5   :  { %v314_v42 = vrot.slane %v313_v36, 4  ;;  %v321_v43 = vrot.slane %v320_v37, 4 }
  0xe6   :  { %v1408_v47 = vpop.f32.mrf.mxu0  ;;  %v1410_v48 = vpop.f32.mrf.mxu1  ;;  %544 = vmatpush.msra.mxu3 %v450_v8  ;;  %529 = vmatpush.msra.mxu2 %v408_v23 }
  0xe7   :  { %v315_v49 = vadd.f32 %v314_v42, %v313_v36  ;;  %v322_v50 = vadd.f32 %v321_v43, %v320_v37  ;;  %v463_v36 = vld [vmem:[%s2076_s3 + $0x1c8] sm:$0xff]  ;;  %v429_v37 = vld [vmem:[%s2076_s3 + $0xb8] sm:$0xff]  ;;  %v151_v54 = vadd.f32 %v1408_v47, %v1348_v51 }
  0xe8   :  { %545 = vmatpush.msra.mxu3 %v448_v12  ;;  %530 = vmatpush.msra.mxu2 %v406_v25  ;;  %v459_v42 = vld [vmem:[%s2076_s3 + $0x1a8] sm:$0xff]  ;;  %v421_v47 = vld [vmem:[%s2076_s3 + $0x78] sm:$0xff] }
  0xe9   :  { %v316_v55 = vrot.slane %v315_v49, 2  ;;  %v323_v56 = vrot.slane %v322_v50, 2  ;;  %v255_v1 = vmax.f32 %v151_v54, 0.0  ;;  %v447_v25 = vld [vmem:[%s2076_s3 + $0x148] sm:$0xff] }
  0xea   :  { %546 = vmatpush.msra.mxu3 %v446_v14  ;;  %555 = vmatpush.msrb.mxu2 %v437_v27  ;;  %v449_v14 = vld [vmem:[%s2076_s3 + $0x158] sm:$0xff] }
  0xeb   :  { %v317_v59 = vadd.f32 %v316_v55, %v315_v49  ;;  %v324_v60 = vadd.f32 %v323_v56, %v322_v50  ;;  %v425_v50 = vld [vmem:[%s2076_s3 + $0x98] sm:$0xff]  ;;  %v216_v55 = vadd.f32 %v1410_v48, %v1350_v52 }
  0xec   :  { %547 = vmatpush.msra.mxu3 %v444_v18  ;;  %556 = vmatpush.msrb.mxu2 %v435_v31  ;;  %v453_v48 = vld [vmem:[%s2076_s3 + $0x178] sm:$0xff] }
  0xed   :  { %v318_v63 = vrot.slane %v317_v59, 1  ;;  %v325_v0 = vrot.slane %v324_v60, 1 }
  0xee   :  { %v1436_v3 = vpop.f32.mrf.mxu0  ;;  %v1438_v4 = vpop.f32.mrf.mxu1  ;;  %548 = vmatpush.msra.mxu3 %v442_v22  ;;  %557 = vmatpush.msrb.mxu2 %v433_v33  ;;  %v445_v33 = vld [vmem:[%s2076_s3 + $0x138] sm:$0xff] }
  0xef   :  { %v319_v5 = vadd.f32 %v318_v63, %v317_v59  ;;  %v326_v6 = vadd.f32 %v325_v0, %v324_v60  ;;  %v154_v43 = vadd.f32 %v1436_v3, %v1348_v51  ;;  %v219_v44 = vadd.f32 %v1438_v4, %v1350_v52  ;;  %v455_v59 = vld [vmem:[%s2076_s3 + $0x188] sm:$0xff] }
  0xf0   :  { %549 = vmatpush.msra.mxu3 %v440_v24  ;;  %558 = vmatpush.msrb.mxu2 %v431_v35  ;;  %v419_v0 = vld [vmem:[%s2076_s3 + $0x68] sm:$0xff] }
  0xf1   :  { %v396_v9 = vmul.f32 %v1362_v45, %v319_v5  ;;  %v397_v10 = vmul.f32 %v1362_v45, %v326_v6  ;;  %v257_v60 = vmax.f32 %v154_v43, 0.0  ;;  %v258_v61 = vmax.f32 %v219_v44, 0.0  ;;  %v451_v4 = vld [vmem:[%s2076_s3 + $0x168] sm:$0xff] }
  0xf2   :  { %550 = vmatpush.msra.mxu3 %v438_v26  ;;  %559 = vmatpush.msrb.mxu2 %v429_v37  ;;  %v256_v5 = vmax.f32 %v216_v55, 0.0  ;;  %v443_v35 = vld [vmem:[%s2076_s3 + $0x128] sm:$0xff] }
  0xf3   :  { %v1460_v15 = vsel %vm496_vm3, %v396_v9, %v495_v40  ;;  %v1462_v16 = vsel %vm496_vm3, %v397_v10, %v507_v41  ;;  %v427_v41 = vld [vmem:[%s2076_s3 + $0xa8] sm:$0xff]  ;;  %v417_v10 = vld [vmem:[%s2076_s3 + $0x58] sm:$0xff]  ;;  %v327_v11 = vadd.f32 %v257_v60, %v255_v1 }
  0xf4   :  { %575 = vmatpush.msrb.mxu3 %v469_v28  ;;  %560 = vmatpush.msrb.mxu2 %v427_v41  ;;  %v334_v17 = vadd.f32 %v258_v61, %v256_v5  ;;  %v441_v41 = vld [vmem:[%s2076_s3 + $0x118] sm:$0xff] }
  0xf5   :  { %v328_v26 = vrot.slane %v327_v11, 4 }
  0xf6   :  { %v156_v19 = vpop.f32.mrf.mxu0  ;;  %v221_v20 = vpop.f32.mrf.mxu1  ;;  %576 = vmatpush.msrb.mxu3 %v467_v32  ;;  %561 = vmatpush.msrb.mxu2 %v425_v50  ;;  %v413_v32 = vld [vmem:[%s2076_s3 + $0x38] sm:$0xff]  ;;  %v439_v50 = vld [vmem:[%s2076_s3 + $0x108] sm:$0xff] }
  0xf7   :  { %v157_v56 = vadd.f32 %v156_v19, %v1348_v51  ;;  %v222_v57 = vadd.f32 %v221_v20, %v1350_v52  ;;  %v415_v20 = vld [vmem:[%s2076_s3 + $0x48] sm:$0xff] }
  0xf8   :  { %577 = vmatpush.msrb.mxu3 %v465_v34  ;;  %562 = vmatpush.msrb.mxu2 %v423_v58  ;;  %v411_v34 = vld [vmem:[%s2076_s3 + $0x28] sm:$0xff] }
  0xf9   :  { %v259_v6 = vmax.f32 %v157_v56, 0.0  ;;  %v260_v7 = vmax.f32 %v222_v57, 0.0 }
  0xfa   :  { %578 = vmatpush.msrb.mxu3 %v463_v36  ;;  %563 = vmatpush.msrb.mxu2 %v421_v47 }
  0xfc   :  { %579 = vmatpush.msrb.mxu3 %v461_v38  ;;  %564 = vmatpush.msrb.mxu2 %v419_v0 }
  0xfe   :  { %v159_v29 = vpop.f32.mrf.mxu0  ;;  %v224_v30 = vpop.f32.mrf.mxu1  ;;  %580 = vmatpush.msrb.mxu3 %v459_v42  ;;  %565 = vmatpush.msrb.mxu2 %v417_v10  ;;  %v329_v42 = vadd.f32 %v328_v26, %v327_v11 }
  0xff   :  { %v160_v46 = vadd.f32 %v159_v29, %v1348_v51  ;;  %v225_v49 = vadd.f32 %v224_v30, %v1350_v52  ;;  %v335_v29 = vrot.slane %v334_v17, 4 }
 0x100   :  { %581 = vmatpush.msrb.mxu3 %v457_v53  ;;  %566 = vmatpush.msrb.mxu2 %v415_v20  ;;  %v330_v55 = vrot.slane %v329_v42, 2 }
 0x101   :  { %v261_v62 = vmax.f32 %v160_v46, 0.0  ;;  %v262_v63 = vmax.f32 %v225_v49, 0.0  ;;  %v336_v43 = vadd.f32 %v335_v29, %v334_v17  ;;  %v407_v49 = vld [vmem:[%s2076_s3 + $0x8] sm:$0xff] }
 0x102   :  { %582 = vmatpush.msrb.mxu3 %v455_v59  ;;  %567 = vmatpush.msrb.mxu2 %v413_v32  ;;  %v331_v1 = vadd.f32 %v330_v55, %v329_v42 }
 0x103   :  { %v341_v18 = vadd.f32 %v261_v62, %v259_v6  ;;  %v348_v19 = vadd.f32 %v262_v63, %v260_v7  ;;  %v337_v56 = vrot.slane %v336_v43, 2 }
 0x104   :  { %583 = vmatpush.msrb.mxu3 %v453_v48  ;;  %568 = vmatpush.msrb.mxu2 %v411_v34 }
 0x105   :  { %v342_v30 = vrot.slane %v341_v18, 4  ;;  %v349_v31 = vrot.slane %v348_v19, 4 }
 0x106   :  { %v162_v39 = vpop.f32.mrf.mxu0  ;;  %v227_v40 = vpop.f32.mrf.mxu1  ;;  %584 = vmatpush.msrb.mxu3 %v451_v4 }
 0x107   :  { %v163_v2 = vadd.f32 %v162_v39, %v1348_v51  ;;  %v228_v3 = vadd.f32 %v227_v40, %v1350_v52  ;;  %v409_v40 = vld [vmem:[%s2076_s3 + $0x18] sm:$0xff]  ;;  %v343_v44 = vadd.f32 %v342_v30, %v341_v18  ;;  %v350_v46 = vadd.f32 %v349_v31, %v348_v19 }
 0x108   :  { %585 = vmatpush.msrb.mxu3 %v449_v14  ;;  %569 = vmatpush.msrb.mxu2 %v409_v40 }
 0x109   :  { %v263_v21 = vmax.f32 %v163_v2, 0.0  ;;  %v264_v22 = vmax.f32 %v228_v3, 0.0  ;;  %v344_v57 = vrot.slane %v343_v44, 2  ;;  %v351_v58 = vrot.slane %v350_v46, 2 }
 0x10a   :  { %586 = vmatpush.msrb.mxu3 %v447_v25  ;;  %570 = vmatpush.msrb.mxu2 %v407_v49  ;;  %v338_v2 = vadd.f32 %v337_v56, %v336_v43  ;;  %v627_v56 = vld [vmem:[%s2078_s5 + $0xf0] sm:$0xff] }
 0x10b   :  { %v345_v3 = vadd.f32 %v344_v57, %v343_v44  ;;  %v352_v4 = vadd.f32 %v351_v58, %v350_v46  ;;  %v659_v57 = vld [vmem:[%s2078_s5 + $0x1f0] sm:$0xff] }
 0x10c   :  { %587 = vmatpush.msrb.mxu3 %v445_v33  ;;  %v339_v14 = vrot.slane %v338_v2, 1 }
 0x10d   :  { %v346_v17 = vrot.slane %v345_v3, 1  ;;  %v353_v18 = vrot.slane %v352_v4, 1 }
 0x10e   :  { %v165_v8 = vpop.f32.mrf.mxu0  ;;  %v230_v9 = vpop.f32.mrf.mxu1  ;;  %588 = vmatpush.msrb.mxu3 %v443_v35 }
 0x10f   :  { %v166_v12 = vadd.f32 %v165_v8, %v1348_v51  ;;  %v231_v13 = vadd.f32 %v230_v9, %v1350_v52  ;;  %v347_v25 = vadd.f32 %v346_v17, %v345_v3  ;;  %v354_v26 = vadd.f32 %v353_v18, %v352_v4  ;;  %v613_v3 = vld [vmem:[%s2078_s5 + $0x80] sm:$0xff] }
 0x110   :  { %589 = vmatpush.msrb.mxu3 %v441_v41  ;;  %v645_v4 = vld [vmem:[%s2078_s5 + $0x180] sm:$0xff] }
 0x111   :  { %v265_v23 = vmax.f32 %v166_v12, 0.0  ;;  %v266_v24 = vmax.f32 %v231_v13, 0.0  ;;  %v332_v13 = vrot.slane %v331_v1, 1  ;;  %v601_v17 = vld [vmem:[%s2078_s5 + $0x20] sm:$0xff] }
 0x112   :  { %590 = vmatpush.msrb.mxu3 %v439_v50  ;;  %v633_v18 = vld [vmem:[%s2078_s5 + $0x120] sm:$0xff] }
 0x113   :  { %v355_v27 = vadd.f32 %v265_v23, %v263_v21  ;;  %v362_v28 = vadd.f32 %v266_v24, %v264_v22  ;;  %v333_v23 = vadd.f32 %v332_v13, %v331_v1  ;;  %v340_v24 = vadd.f32 %v339_v14, %v338_v2  ;;  %v615_v1 = vld [vmem:[%s2078_s5 + $0x90] sm:$0xff] }
 0x114   :  { %v647_v2 = vld [vmem:[%s2078_s5 + $0x190] sm:$0xff] }
 0x115   :  { %v356_v36 = vrot.slane %v355_v27, 4  ;;  %v363_v37 = vrot.slane %v362_v28, 4  ;;  %v398_v33 = vmul.f32 %v1362_v45, %v333_v23  ;;  %v399_v34 = vmul.f32 %v1362_v45, %v340_v24  ;;  %v603_v13 = vld [vmem:[%s2078_s5 + $0x30] sm:$0xff]  ;;  %v626_v23 = vld [vmem:[%s2078_s5 + $0xe8] sm:$0xff] }
 0x116   :  { %v168_v38 = vpop.f32.mrf.mxu0  ;;  %v233_v39 = vpop.f32.mrf.mxu1  ;;  %v635_v14 = vld [vmem:[%s2078_s5 + $0x130] sm:$0xff]  ;;  %v658_v24 = vld [vmem:[%s2078_s5 + $0x1e8] sm:$0xff] }
 0x117   :  { %v357_v53 = vadd.f32 %v356_v36, %v355_v27  ;;  %v364_v54 = vadd.f32 %v363_v37, %v362_v28  ;;  %v169_v59 = vadd.f32 %v168_v38, %v1348_v51  ;;  %v234_v60 = vadd.f32 %v233_v39, %v1350_v52 }
 0x118   :  { %v400_v36 = vmul.f32 %v1362_v45, %v347_v25  ;;  %v401_v38 = vmul.f32 %v1362_v45, %v354_v26  ;;  %v499_v43 = vsel %vm498_vm4, %v398_v33, %v1460_v15  ;;  %v509_v44 = vsel %vm498_vm4, %v399_v34, %v1462_v16  ;;  %v625_v16 = vld [vmem:[%s2078_s5 + $0xe0] sm:$0xff]  ;;  %v624_v25 = vld [vmem:[%s2078_s5 + $0xd8] sm:$0xff] }
 0x119   :  { %v358_v47 = vrot.slane %v357_v53, 2  ;;  %v365_v48 = vrot.slane %v364_v54, 2  ;;  %v267_v5 = vmax.f32 %v169_v59, 0.0  ;;  %v268_v6 = vmax.f32 %v234_v60, 0.0  ;;  %v623_v59 = vld [vmem:[%s2078_s5 + $0xd0] sm:$0xff]  ;;  %v656_v26 = vld [vmem:[%s2078_s5 + $0x1d8] sm:$0xff] }
 0x11a   :  { %v501_v49 = vsel %vm500_vm5, %v400_v36, %v499_v43  ;;  %v655_v60 = vld [vmem:[%s2078_s5 + $0x1d0] sm:$0xff]  ;;  %v612_v33 = vld [vmem:[%s2078_s5 + $0x78] sm:$0xff]  ;;  %v650_v36 = vld [vmem:[%s2078_s5 + $0x1a8] sm:$0xff] }
 0x11b   :  { %v359_v9 = vadd.f32 %v358_v47, %v357_v53  ;;  %v366_v10 = vadd.f32 %v365_v48, %v364_v54  ;;  %v510_v53 = vsel %vm500_vm5, %v401_v38, %v509_v44  ;;  %v621_v47 = vld [vmem:[%s2078_s5 + $0xc0] sm:$0xff]  ;;  %v652_v34 = vld [vmem:[%s2078_s5 + $0x1b8] sm:$0xff]  ;;  %v602_v43 = vld [vmem:[%s2078_s5 + $0x28] sm:$0xff] }
 0x11c   :  { %v653_v48 = vld [vmem:[%s2078_s5 + $0x1c0] sm:$0xff]  ;;  %v648_v38 = vld [vmem:[%s2078_s5 + $0x198] sm:$0xff]  ;;  %v642_v44 = vld [vmem:[%s2078_s5 + $0x168] sm:$0xff] }
 0x11d   :  { %v360_v20 = vrot.slane %v359_v9, 1 }
 0x11e   :  { %v171_v61 = vpop.f32.mrf.mxu0  ;;  %v236_v62 = vpop.f32.mrf.mxu1 }
 0x11f   :  { %v172_v63 = vadd.f32 %v171_v61, %v1348_v51  ;;  %v237_v0 = vadd.f32 %v236_v62, %v1350_v52  ;;  %v367_v52 = vrot.slane %v366_v10, 1  ;;  %v361_v29 = vadd.f32 %v360_v20, %v359_v9  ;;  %v619_v61 = vld [vmem:[%s2078_s5 + $0xb0] sm:$0xff]  ;;  %v597_v20 = vld [vmem:[%s2078_s5] sm:$0xff] }
 0x120   :  { %v651_v62 = vld [vmem:[%s2078_s5 + $0x1b0] sm:$0xff] }
 0x121   :  { %v269_v7 = vmax.f32 %v172_v63, 0.0  ;;  %v270_v8 = vmax.f32 %v237_v0, 0.0  ;;  %v368_v30 = vadd.f32 %v367_v52, %v366_v10  ;;  %v402_v39 = vmul.f32 %v1362_v45, %v361_v29  ;;  %v617_v63 = vld [vmem:[%s2078_s5 + $0xa0] sm:$0xff]  ;;  %v607_v9 = vld [vmem:[%s2078_s5 + $0x50] sm:$0xff]  ;;  %v620_v29 = vld [vmem:[%s2078_s5 + $0xb8] sm:$0xff] }
 0x122   :  { %v649_v0 = vld [vmem:[%s2078_s5 + $0x1a0] sm:$0xff]  ;;  %v639_v10 = vld [vmem:[%s2078_s5 + $0x150] sm:$0xff] }
 0x123   :  { %v369_v11 = vadd.f32 %v269_v7, %v267_v5  ;;  %v376_v12 = vadd.f32 %v270_v8, %v268_v6  ;;  %v403_v40 = vmul.f32 %v1362_v45, %v368_v30  ;;  %v503_v54 = vsel %vm502_vm6, %v402_v39, %v501_v49  ;;  %v611_v5 = vld [vmem:[%s2078_s5 + $0x70] sm:$0xff]  ;;  %v609_v7 = vld [vmem:[%s2078_s5 + $0x60] sm:$0xff]  ;;  %v618_v30 = vld [vmem:[%s2078_s5 + $0xa8] sm:$0xff] }
 0x124   :  { %v643_v6 = vld [vmem:[%s2078_s5 + $0x170] sm:$0xff]  ;;  %v641_v8 = vld [vmem:[%s2078_s5 + $0x160] sm:$0xff]  ;;  %v606_v39 = vld [vmem:[%s2078_s5 + $0x48] sm:$0xff] }
 0x125   :  { %v370_v19 = vrot.slane %v369_v11, 4  ;;  %v377_v51 = vrot.slane %v376_v12, 4  ;;  %v511_v55 = vsel %vm502_vm6, %v403_v40, %v510_v53  ;;  %v629_v52 = vld [vmem:[%s2078_s5 + $0x100] sm:$0xff]  ;;  %v646_v40 = vld [vmem:[%s2078_s5 + $0x188] sm:$0xff]  ;;  %v640_v49 = vld [vmem:[%s2078_s5 + $0x158] sm:$0xff] }
 0x126   :  { %v638_v53 = vld [vmem:[%s2078_s5 + $0x148] sm:$0xff] }
 0x127   :  { %v371_v21 = vadd.f32 %v370_v19, %v369_v11  ;;  %v378_v22 = vadd.f32 %v377_v51, %v376_v12  ;;  %v605_v11 = vld [vmem:[%s2078_s5 + $0x40] sm:$0xff]  ;;  %v599_v19 = vld [vmem:[%s2078_s5 + $0x10] sm:$0xff] }
 0x128   :  { %v637_v12 = vld [vmem:[%s2078_s5 + $0x140] sm:$0xff]  ;;  %v631_v51 = vld [vmem:[%s2078_s5 + $0x110] sm:$0xff] }
 0x129   :  { %v372_v27 = vrot.slane %v371_v21, 2  ;;  %v379_v28 = vrot.slane %v378_v22, 2 }
 0x12b   :  { %v373_v31 = vadd.f32 %v372_v27, %v371_v21  ;;  %v380_v32 = vadd.f32 %v379_v28, %v378_v22  ;;  %v628_v21 = vld [vmem:[%s2078_s5 + $0xf8] sm:$0xff]  ;;  %v622_v27 = vld [vmem:[%s2078_s5 + $0xc8] sm:$0xff] }
 0x12c   :  { %v660_v22 = vld [vmem:[%s2078_s5 + $0x1f8] sm:$0xff]  ;;  %v654_v28 = vld [vmem:[%s2078_s5 + $0x1c8] sm:$0xff] }
 0x12d   :  { %v374_v35 = vrot.slane %v373_v31, 1  ;;  %v381_v37 = vrot.slane %v380_v32, 1 }
 0x12f   :  { %v375_v41 = vadd.f32 %v374_v35, %v373_v31  ;;  %v382_v42 = vadd.f32 %v381_v37, %v380_v32  ;;  %v616_v31 = vld [vmem:[%s2078_s5 + $0x98] sm:$0xff]  ;;  %v614_v32 = vld [vmem:[%s2078_s5 + $0x88] sm:$0xff] }
 0x130   :  { %v610_v35 = vld [vmem:[%s2078_s5 + $0x68] sm:$0xff]  ;;  %v608_v37 = vld [vmem:[%s2078_s5 + $0x58] sm:$0xff] }
 0x131   :  { %v404_v46 = vmul.f32 %v1362_v45, %v375_v41  ;;  %v405_v50 = vmul.f32 %v1362_v45, %v382_v42  ;;  %v657_v45 = vld [vmem:[%s2078_s5 + $0x1e0] sm:$0xff]  ;;  %v604_v41 = vld [vmem:[%s2078_s5 + $0x38] sm:$0xff] }
 0x132   :  { %v644_v42 = vld [vmem:[%s2078_s5 + $0x178] sm:$0xff] }
 0x133   :  { %v505_v15 = vsel %vm504_vm7, %v404_v46, %v503_v54  ;;  %v512_v58 = vsel %vm504_vm7, %v405_v50, %v511_v55  ;;  %v600_v46 = vld [vmem:[%s2078_s5 + $0x18] sm:$0xff]  ;;  %v598_v50 = vld [vmem:[%s2078_s5 + $0x8] sm:$0xff] }
 0x134   :  { %531 = vmatmul.f32.vlgmr.msra.gmra.mxu2 %v505_v15  ;;  %551 = vmatmul.f32.vlgmr.msra.gmra.mxu3 %v512_v58  ;;  %v636_v54 = vld [vmem:[%s2078_s5 + $0x138] sm:$0xff]  ;;  %v634_v55 = vld [vmem:[%s2078_s5 + $0x128] sm:$0xff] }
 0x135   :  { %667 = vmatpush.msra.mxu2 %v627_v56  ;;  %687 = vmatpush.msra.mxu3 %v659_v57  ;;  %v632_v56 = vld [vmem:[%s2078_s5 + $0x118] sm:$0xff]  ;;  %v630_v57 = vld [vmem:[%s2078_s5 + $0x108] sm:$0xff] }
 0x137   :  { %668 = vmatpush.msra.mxu2 %v625_v16  ;;  %688 = vmatpush.msra.mxu3 %v657_v45  ;;  %v763_v16 = vld [vmem:[%s2080_s7 + $0x70] sm:$0xff] }
 0x138   :  { %v779_v45 = vld [vmem:[%s2080_s7 + $0xf0] sm:$0xff] }
 0x139   :  { %669 = vmatpush.msra.mxu2 %v623_v59  ;;  %689 = vmatpush.msra.mxu3 %v655_v60  ;;  %v762_v59 = vld [vmem:[%s2080_s7 + $0x68] sm:$0xff] }
 0x13a   :  { %v778_v60 = vld [vmem:[%s2080_s7 + $0xe8] sm:$0xff] }
 0x13b   :  { %670 = vmatpush.msra.mxu2 %v621_v47  ;;  %690 = vmatpush.msra.mxu3 %v653_v48  ;;  %v470_v47 = vld [vmem:[%s2077_s4] sm:$0x3]  ;;  %s976_s4 = sshll.u32 %s2088_s15, 4  ;;  %s977_s4 = int_to_ptr.hbm [resolvable:$true] %s976_s4 }
 0x13c   :  { %571 = vmatmul.f32.vlgmr.msrb.gmra.mxu2 %v505_v15  ;;  %591 = vmatmul.f32.vlgmr.msrb.gmra.mxu3 %v512_v58  ;;  %v764_v15 = vld [vmem:[%s2080_s7 + $0x78] sm:$0xff]  ;;  %v761_v48 = vld [vmem:[%s2080_s7 + $0x60] sm:$0xff] }
 0x13d   :  { %671 = vmatpush.msra.mxu2 %v619_v61  ;;  %691 = vmatpush.msra.mxu3 %v651_v62  ;;  %v780_v58 = vld [vmem:[%s2080_s7 + $0xf8] sm:$0xff]  ;;  %v777_v61 = vld [vmem:[%s2080_s7 + $0xe0] sm:$0xff]  ;;  %v472_v62 = vperm.slane %v470_v47, 0 }
 0x13e   :  { %785 = vmatpush.msrb.mxu0 %v764_v15  ;;  %805 = vmatpush.msrb.mxu1 %v780_v58 }
 0x13f   :  { %672 = vmatpush.msra.mxu2 %v617_v63  ;;  %692 = vmatpush.msra.mxu3 %v649_v0  ;;  %v760_v63 = vld [vmem:[%s2080_s7 + $0x58] sm:$0xff] }
 0x140   :  { %786 = vmatpush.msrb.mxu0 %v763_v16  ;;  %806 = vmatpush.msrb.mxu1 %v779_v45  ;;  %v776_v0 = vld [vmem:[%s2080_s7 + $0xd8] sm:$0xff]  ;;  %v832_v45 = vld [vmem:[%s2082_s9 + $0x30] sm:$0xff] }
 0x141   :  { %673 = vmatpush.msra.mxu2 %v615_v1  ;;  %693 = vmatpush.msra.mxu3 %v647_v2  ;;  %v759_v1 = vld [vmem:[%s2080_s7 + $0x50] sm:$0xff] }
 0x142   :  { %787 = vmatpush.msrb.mxu0 %v762_v59  ;;  %807 = vmatpush.msrb.mxu1 %v778_v60  ;;  %v775_v2 = vld [vmem:[%s2080_s7 + $0xd0] sm:$0xff]  ;;  %v831_v59 = vld [vmem:[%s2082_s9 + $0x28] sm:$0xff]  ;;  %v830_v60 = vld [vmem:[%s2082_s9 + $0x20] sm:$0xff] }
 0x143   :  { %674 = vmatpush.msra.mxu2 %v613_v3  ;;  %694 = vmatpush.msra.mxu3 %v645_v4 }
 0x144   :  { %788 = vmatpush.msrb.mxu0 %v761_v48  ;;  %808 = vmatpush.msrb.mxu1 %v777_v61  ;;  %v828_v48 = vld [vmem:[%s2082_s9 + $0x10] sm:$0xff]  ;;  %v827_v61 = vld [vmem:[%s2082_s9 + $0x8] sm:$0xff] }
 0x145   :  { %675 = vmatpush.msra.mxu2 %v611_v5  ;;  %695 = vmatpush.msra.mxu3 %v643_v6  ;;  %v758_v6 = vld [vmem:[%s2080_s7 + $0x48] sm:$0xff] }
 0x146   :  { %789 = vmatpush.msrb.mxu0 %v760_v63  ;;  %809 = vmatpush.msrb.mxu1 %v776_v0  ;;  %v883_v63 = vld [vmem:[%s2084_s11 + $0x78] sm:$0xff]  ;;  %v882_v0 = vld [vmem:[%s2084_s11 + $0x70] sm:$0xff] }
 0x147   :  { %676 = vmatpush.msra.mxu2 %v609_v7  ;;  %696 = vmatpush.msra.mxu3 %v641_v8  ;;  %v774_v7 = vld [vmem:[%s2080_s7 + $0xc8] sm:$0xff] }
 0x148   :  { %790 = vmatpush.msrb.mxu0 %v759_v1  ;;  %810 = vmatpush.msrb.mxu1 %v775_v2  ;;  %v881_v1 = vld [vmem:[%s2084_s11 + $0x68] sm:$0xff]  ;;  %v880_v2 = vld [vmem:[%s2084_s11 + $0x60] sm:$0xff] }
 0x149   :  { %677 = vmatpush.msra.mxu2 %v607_v9  ;;  %697 = vmatpush.msra.mxu3 %v639_v10  ;;  %v757_v9 = vld [vmem:[%s2080_s7 + $0x40] sm:$0xff] }
 0x14a   :  { %v773_v10 = vld [vmem:[%s2080_s7 + $0xc0] sm:$0xff]  ;;  %791 = vmatpush.msrb.mxu0 %v758_v6  ;;  %811 = vmatpush.msrb.mxu1 %v774_v7  ;;  %v875_v7 = vld [vmem:[%s2084_s11 + $0x38] sm:$0xff] }
 0x14b   :  { %678 = vmatpush.msra.mxu2 %v605_v11  ;;  %698 = vmatpush.msra.mxu3 %v637_v12  ;;  %v473_v12 = vperm.slane %v470_v47, 1  ;;  %v829_v47 = vld [vmem:[%s2082_s9 + $0x18] sm:$0xff]  ;;  %v876_v6 = vld [vmem:[%s2084_s11 + $0x40] sm:$0xff] }
 0x14c   :  { %792 = vmatpush.msrb.mxu0 %v757_v9  ;;  %812 = vmatpush.msrb.mxu1 %v773_v10  ;;  %v873_v9 = vld [vmem:[%s2084_s11 + $0x28] sm:$0xff]  ;;  %v872_v10 = vld [vmem:[%s2084_s11 + $0x20] sm:$0xff] }
 0x14d   :  { %679 = vmatpush.msra.mxu2 %v603_v13  ;;  %699 = vmatpush.msra.mxu3 %v635_v14  ;;  %v756_v13 = vld [vmem:[%s2080_s7 + $0x38] sm:$0xff] }
 0x14e   :  { %v772_v14 = vld [vmem:[%s2080_s7 + $0xb8] sm:$0xff]  ;;  %793 = vmatpush.msrb.mxu0 %v756_v13 }
 0x14f   :  { %680 = vmatpush.msra.mxu2 %v601_v17  ;;  %700 = vmatpush.msra.mxu3 %v633_v18  ;;  %v755_v17 = vld [vmem:[%s2080_s7 + $0x30] sm:$0xff] }
 0x150   :  { %v771_v18 = vld [vmem:[%s2080_s7 + $0xb0] sm:$0xff]  ;;  %813 = vmatpush.msrb.mxu1 %v772_v14  ;;  %794 = vmatpush.msrb.mxu0 %v755_v17 }
 0x151   :  { %681 = vmatpush.msra.mxu2 %v599_v19  ;;  %701 = vmatpush.msra.mxu3 %v631_v51 }
 0x152   :  { %814 = vmatpush.msrb.mxu1 %v771_v18 }
 0x153   :  { %682 = vmatpush.msra.mxu2 %v597_v20  ;;  %702 = vmatpush.msra.mxu3 %v629_v52  ;;  %v754_v20 = vld [vmem:[%s2080_s7 + $0x28] sm:$0xff] }
 0x154   :  { %v770_v52 = vld [vmem:[%s2080_s7 + $0xa8] sm:$0xff]  ;;  %795 = vmatpush.msrb.mxu0 %v754_v20 }
 0x155   :  { %707 = vmatpush.msrb.mxu2 %v628_v21  ;;  %727 = vmatpush.msrb.mxu3 %v660_v22  ;;  %v869_v20 = vld [vmem:[%s2084_s11 + $0x8] sm:$0xff] }
 0x156   :  { %815 = vmatpush.msrb.mxu1 %v770_v52  ;;  %v868_v52 = vld [vmem:[%s2084_s11] sm:$0xff] }
 0x157   :  { %708 = vmatpush.msrb.mxu2 %v626_v23  ;;  %728 = vmatpush.msrb.mxu3 %v658_v24  ;;  %v753_v23 = vld [vmem:[%s2080_s7 + $0x20] sm:$0xff] }
 0x158   :  { %v769_v24 = vld [vmem:[%s2080_s7 + $0xa0] sm:$0xff]  ;;  %796 = vmatpush.msrb.mxu0 %v753_v23  ;;  %v941_v23 = vld [vmem:[%s2086_s13 + $0x68] sm:$0xff] }
 0x159   :  { %709 = vmatpush.msrb.mxu2 %v624_v25  ;;  %729 = vmatpush.msrb.mxu3 %v656_v26  ;;  %v752_v26 = vld [vmem:[%s2080_s7 + $0x18] sm:$0xff] }
 0x15a   :  { %816 = vmatpush.msrb.mxu1 %v769_v24  ;;  %797 = vmatpush.msrb.mxu0 %v752_v26  ;;  %v940_v24 = vld [vmem:[%s2086_s13 + $0x60] sm:$0xff]  ;;  %v938_v26 = vld [vmem:[%s2086_s13 + $0x50] sm:$0xff] }
 0x15b   :  { %710 = vmatpush.msrb.mxu2 %v622_v27  ;;  %730 = vmatpush.msrb.mxu3 %v654_v28  ;;  %v768_v27 = vld [vmem:[%s2080_s7 + $0x98] sm:$0xff]  ;;  %v751_v28 = vld [vmem:[%s2080_s7 + $0x10] sm:$0xff] }
 0x15c   :  { %817 = vmatpush.msrb.mxu1 %v768_v27  ;;  %798 = vmatpush.msrb.mxu0 %v751_v28  ;;  %v937_v27 = vld [vmem:[%s2086_s13 + $0x48] sm:$0xff]  ;;  %v936_v28 = vld [vmem:[%s2086_s13 + $0x40] sm:$0xff] }
 0x15d   :  { %711 = vmatpush.msrb.mxu2 %v620_v29  ;;  %731 = vmatpush.msrb.mxu3 %v652_v34  ;;  %v767_v29 = vld [vmem:[%s2080_s7 + $0x90] sm:$0xff]  ;;  %v841_v34 = vld [vmem:[%s2082_s9 + $0x78] sm:$0xff] }
 0x15e   :  { %818 = vmatpush.msrb.mxu1 %v767_v29  ;;  %v935_v29 = vld [vmem:[%s2086_s13 + $0x38] sm:$0xff] }
 0x15f   :  { %712 = vmatpush.msrb.mxu2 %v618_v30  ;;  %732 = vmatpush.msrb.mxu3 %v650_v36  ;;  %v750_v30 = vld [vmem:[%s2080_s7 + $0x8] sm:$0xff] }
 0x160   :  { %799 = vmatpush.msrb.mxu0 %v750_v30  ;;  %v839_v36 = vld [vmem:[%s2082_s9 + $0x68] sm:$0xff]  ;;  %v934_v30 = vld [vmem:[%s2086_s13 + $0x30] sm:$0xff] }
 0x161   :  { %713 = vmatpush.msrb.mxu2 %v616_v31  ;;  %733 = vmatpush.msrb.mxu3 %v648_v38  ;;  %v766_v31 = vld [vmem:[%s2080_s7 + $0x88] sm:$0xff]  ;;  %v837_v38 = vld [vmem:[%s2082_s9 + $0x58] sm:$0xff] }
 0x162   :  { %819 = vmatpush.msrb.mxu1 %v766_v31  ;;  %v933_v31 = vld [vmem:[%s2086_s13 + $0x28] sm:$0xff] }
 0x163   :  { %714 = vmatpush.msrb.mxu2 %v614_v32  ;;  %734 = vmatpush.msrb.mxu3 %v646_v40  ;;  %v749_v32 = vld [vmem:[%s2080_s7] sm:$0xff]  ;;  %v835_v40 = vld [vmem:[%s2082_s9 + $0x48] sm:$0xff] }
 0x164   :  { %800 = vmatpush.msrb.mxu0 %v749_v32  ;;  %v932_v32 = vld [vmem:[%s2086_s13 + $0x20] sm:$0xff] }
 0x165   :  { %715 = vmatpush.msrb.mxu2 %v612_v33  ;;  %735 = vmatpush.msrb.mxu3 %v644_v42  ;;  %v765_v33 = vld [vmem:[%s2080_s7 + $0x80] sm:$0xff] }
 0x166   :  { %820 = vmatpush.msrb.mxu1 %v765_v33  ;;  %v834_v42 = vld [vmem:[%s2082_s9 + $0x40] sm:$0xff]  ;;  %v931_v33 = vld [vmem:[%s2086_s13 + $0x18] sm:$0xff] }
 0x167   :  { %716 = vmatpush.msrb.mxu2 %v610_v35  ;;  %736 = vmatpush.msrb.mxu3 %v642_v44  ;;  %v840_v35 = vld [vmem:[%s2082_s9 + $0x70] sm:$0xff] }
 0x169   :  { %717 = vmatpush.msrb.mxu2 %v608_v37  ;;  %737 = vmatpush.msrb.mxu3 %v640_v49  ;;  %v838_v37 = vld [vmem:[%s2082_s9 + $0x60] sm:$0xff] }
 0x16b   :  { %718 = vmatpush.msrb.mxu2 %v606_v39  ;;  %738 = vmatpush.msrb.mxu3 %v638_v53  ;;  %v836_v39 = vld [vmem:[%s2082_s9 + $0x50] sm:$0xff] }
 0x16d   :  { %719 = vmatpush.msrb.mxu2 %v604_v41  ;;  %739 = vmatpush.msrb.mxu3 %v636_v54  ;;  %v661_v41 = vld [vmem:[%s2079_s6] sm:$0x3] }
 0x16e   :  { %v663_v44 = vperm.slane %v661_v41, 0 }
 0x16f   :  { %720 = vmatpush.msrb.mxu2 %v602_v43  ;;  %740 = vmatpush.msrb.mxu3 %v634_v55  ;;  %v664_v55 = vperm.slane %v661_v41, 1  ;;  %v1023_v41 = vld [vmem:[%s2085_s12] ss:$0 sm:$0xff]  ;;  %s1109_s12 = smov [#allocation4]  }
 0x171   :  { %721 = vmatpush.msrb.mxu2 %v600_v46  ;;  %741 = vmatpush.msrb.mxu3 %v632_v56  ;;  %v833_v46 = vld [vmem:[%s2082_s9 + $0x38] sm:$0xff] }
 0x173   :  { %722 = vmatpush.msrb.mxu2 %v598_v50  ;;  %742 = vmatpush.msrb.mxu3 %v630_v57 }
 0x1b7   :  { %v532_v3 = vpop.f32.mrf.mxu2  ;;  %v552_v4 = vpop.f32.mrf.mxu3 }
 0x1b8   :  { %v533_v5 = vadd.f32 %v532_v3, %v472_v62  ;;  %v826_v62 = vld [vmem:[%s2082_s9] sm:$0xff]  ;;  %v879_v3 = vld [vmem:[%s2084_s11 + $0x58] sm:$0xff]  ;;  %s1110_s9 = smov [#allocation6]  }
 0x1b9   :  { %s996_s3 = sshll.u32 %s1110_s9, 4  ;;  %s997_s3 = int_to_ptr.vmem [resolvable:$true] %s996_s3 }
 0x1ba   :  { %v553_v8 = vadd.f32 %v552_v4, %v533_v5  ;;  %v878_v4 = vld [vmem:[%s2084_s11 + $0x50] sm:$0xff]  ;;  %v877_v5 = vld [vmem:[%s2084_s11 + $0x48] sm:$0xff] }
 0x1bc   :  { %v595_v11 = vmax.f32 %v553_v8, 0.0  ;;  %v874_v8 = vld [vmem:[%s2084_s11 + $0x30] sm:$0xff] }
 0x1be   :  { %683 = vmatmul.f32.vlgmr.msra.gmra.mxu2 %v595_v11 }
 0x1bf   :  { %v572_v19 = vpop.f32.mrf.mxu2  ;;  %v592_v21 = vpop.f32.mrf.mxu3  ;;  %846 = vmatpush.msra.mxu2 %v841_v34  ;;  %v1022_v34 = vld [vmem:[%s2083_s10] ss:$0 sm:$0xff] }
 0x1c0   :  { %v573_v51 = vadd.f32 %v572_v19, %v473_v12  ;;  %v871_v12 = vld [vmem:[%s2084_s11 + $0x18] sm:$0xff] }
 0x1c1   :  { %847 = vmatpush.msra.mxu2 %v840_v35  ;;  %v930_v35 = vld [vmem:[%s2086_s13 + $0x10] sm:$0xff] }
 0x1c2   :  { %v593_v22 = vadd.f32 %v592_v21, %v573_v51  ;;  %v870_v51 = vld [vmem:[%s2084_s11 + $0x10] sm:$0xff]  ;;  %v943_v21 = vld [vmem:[%s2086_s13 + $0x78] sm:$0xff] }
 0x1c3   :  { %848 = vmatpush.msra.mxu2 %v839_v36  ;;  %948 = vmatpush.msra.mxu0 %v943_v21 }
 0x1c4   :  { %v596_v25 = vmax.f32 %v593_v22, 0.0  ;;  %v942_v22 = vld [vmem:[%s2086_s13 + $0x70] sm:$0xff] }
 0x1c5   :  { %849 = vmatpush.msra.mxu2 %v838_v37  ;;  %949 = vmatpush.msra.mxu0 %v942_v22 }
 0x1c6   :  { %703 = vmatmul.f32.vlgmr.msra.gmra.mxu3 %v596_v25  ;;  %723 = vmatmul.f32.vlgmr.msrb.gmra.mxu2 %v595_v11  ;;  %v1021_v11 = vld [vmem:[%s2081_s8] ss:$0 sm:$0xff] }
 0x1c7   :  { %850 = vmatpush.msra.mxu2 %v837_v38  ;;  %888 = vmatpush.msra.mxu3 %v883_v63 }
 0x1c8   :  { %950 = vmatpush.msra.mxu0 %v941_v23 }
 0x1c9   :  { %851 = vmatpush.msra.mxu2 %v836_v39  ;;  %889 = vmatpush.msra.mxu3 %v882_v0  ;;  %v929_v39 = vld [vmem:[%s2086_s13 + $0x8] sm:$0xff] }
 0x1ca   :  { %951 = vmatpush.msra.mxu0 %v940_v24 }
 0x1cb   :  { %852 = vmatpush.msra.mxu2 %v835_v40  ;;  %890 = vmatpush.msra.mxu3 %v881_v1  ;;  %v928_v40 = vld [vmem:[%s2086_s13] sm:$0xff] }
 0x1cd   :  { %853 = vmatpush.msra.mxu2 %v834_v42  ;;  %891 = vmatpush.msra.mxu3 %v880_v2 }
 0x1ce   :  { %743 = vmatmul.f32.vlgmr.msrb.gmra.mxu3 %v596_v25  ;;  %v939_v25 = vld [vmem:[%s2086_s13 + $0x58] sm:$0xff]  ;;  %s985_s13 = sshll.u32 %s1109_s12, 4  ;;  %s986_s13 = int_to_ptr.vmem [resolvable:$true] %s985_s13 }
 0x1cf   :  { %854 = vmatpush.msra.mxu2 %v833_v46  ;;  %892 = vmatpush.msra.mxu3 %v879_v3 }
 0x1d0   :  { %952 = vmatpush.msra.mxu0 %v939_v25 }
 0x1d1   :  { %855 = vmatpush.msra.mxu2 %v832_v45  ;;  %893 = vmatpush.msra.mxu3 %v878_v4 }
 0x1d2   :  { %953 = vmatpush.msra.mxu0 %v938_v26 }
 0x1d3   :  { %856 = vmatpush.msra.mxu2 %v831_v59  ;;  %894 = vmatpush.msra.mxu3 %v877_v5  ;;  %v1024_v59 = vld [vmem:[%s2087_s14] ss:$0 sm:$0xff] }
 0x1d4   :  { %954 = vmatpush.msra.mxu0 %v937_v27 }
 0x1d5   :  { %857 = vmatpush.msra.mxu2 %v830_v60  ;;  %895 = vmatpush.msra.mxu3 %v876_v6 }
 0x1d6   :  { %955 = vmatpush.msra.mxu0 %v936_v28 }
 0x1d7   :  { %858 = vmatpush.msra.mxu2 %v829_v47  ;;  %896 = vmatpush.msra.mxu3 %v875_v7 }
 0x1d8   :  { %956 = vmatpush.msra.mxu0 %v935_v29 }
 0x1d9   :  { %859 = vmatpush.msra.mxu2 %v828_v48  ;;  %897 = vmatpush.msra.mxu3 %v874_v8 }
 0x1da   :  { %957 = vmatpush.msra.mxu0 %v934_v30 }
 0x1db   :  { %860 = vmatpush.msra.mxu2 %v827_v61  ;;  %898 = vmatpush.msra.mxu3 %v873_v9 }
 0x1dc   :  { %958 = vmatpush.msra.mxu0 %v933_v31 }
 0x1dd   :  { %861 = vmatpush.msra.mxu2 %v826_v62  ;;  %899 = vmatpush.msra.mxu3 %v872_v10 }
 0x1de   :  { %959 = vmatpush.msra.mxu0 %v932_v32 }
 0x1df   :  { %900 = vmatpush.msra.mxu3 %v871_v12 }
 0x1e0   :  { %960 = vmatpush.msra.mxu0 %v931_v33 }
 0x1e1   :  { %901 = vmatpush.msra.mxu3 %v870_v51 }
 0x1e2   :  { %961 = vmatpush.msra.mxu0 %v930_v35 }
 0x1e3   :  { %902 = vmatpush.msra.mxu3 %v869_v20 }
 0x1e4   :  { %962 = vmatpush.msra.mxu0 %v929_v39 }
 0x1e5   :  { %903 = vmatpush.msra.mxu3 %v868_v52 }
 0x1e6   :  { %963 = vmatpush.msra.mxu0 %v928_v40 }
 0x241   :  { %v684_v43 = vpop.f32.mrf.mxu2 }
 0x242   :  { %v685_v49 = vadd.f32 %v684_v43, %v663_v44 }
 0x249   :  { %v704_v50 = vpop.f32.mrf.mxu3  ;;  %v724_v56 = vpop.f32.mrf.mxu2 }
 0x24a   :  { %v705_v53 = vadd.f32 %v704_v50, %v685_v49  ;;  %v725_v57 = vadd.f32 %v724_v56, %v664_v55 }
 0x24c   :  { %v747_v54 = vmax.f32 %v705_v53, 0.0 }
 0x24e   :  { %801 = vmatmul.f32.vlgmr.msrb.gmra.mxu0 %v747_v54 }
 0x251   :  { %v744_v15 = vpop.f32.mrf.mxu3 }
 0x252   :  { %v745_v58 = vadd.f32 %v744_v15, %v725_v57 }
 0x254   :  { %v748_v16 = vmax.f32 %v745_v58, 0.0 }
 0x256   :  { %821 = vmatmul.f32.vlgmr.msrb.gmra.mxu1 %v748_v16 }
 0x2cb   :  { %v802_v13 = vpop.f32.mrf.mxu0 }
 0x2cc   :  { %v803_v14 = vadd.f32 %v1021_v11, %v802_v13 }
 0x2d3   :  { %v822_v17 = vpop.f32.mrf.mxu1 }
 0x2d4   :  { %v823_v18 = vadd.f32 %v822_v17, %v803_v14 }
 0x2d6   :  { %v825_v19 = vmax.f32 %v823_v18, 0.0 }
 0x2d8   :  { %862 = vmatmul.f32.vlgmr.msra.gmra.mxu2 %v825_v19 }
 0x35b   :  { %v863_v36 = vpop.f32.mrf.mxu2 }
 0x35c   :  { %v864_v37 = vadd.f32 %v1022_v34, %v863_v36 }
 0x35e   :  { %v866_v38 = vmax.f32 %v864_v37, 0.0 }
 0x360   :  { %867 = vst [vmem:[#allocation2] sm:$0xff] %v866_v38  ;;  %904 = vmatmul.f32.vlgmr.msra.gmra.mxu3 %v866_v38 }
 0x361   :  { %979 = dma.vmem_to_hbm [thread:$0]  %s975_s22, 128, %s977_s4, [#allocation3]  }
 0x3e3   :  { %v905_v42 = vpop.f32.mrf.mxu3 }
 0x3e4   :  { %v906_v43 = vadd.f32 %v1023_v41, %v905_v42 }
 0x3e6   :  { %v1016_v44 = vmul.f32 -1.442695, %v906_v43  ;;  %964 = vmatmul.f32.vlgmr.msra.gmra.mxu0 %v906_v43 }
 0x3e8   :  { %1027 = vpow2.f32 %v1016_v44 }
 0x3ee   :  { %v1028_v46 = vpop.eup %1027 }
 0x3ef   :  { %v911_v49 = vadd.f32 1.0, %v1028_v46 }
 0x3f1   :  { %1029 = vrcp.f32 %v911_v49  ;;  %v923_v55 = vand.u32 2147483648, %v911_v49  ;;  %v921_v57 = vand.u32 2147483647, %v911_v49  ;;  %vm917_vm9 = vweird.f32 %v911_v49 }
 0x3f3   :  { %v924_v58 = vor.u32 1.1754944e-38, %v923_v55  ;;  %vm922_vm11 = vcmp.eq.f32.partialorder %v921_v57, 8.507059e+37 }
 0x3f7   :  { %v1030_v50 = vpop.eup %1029 }
 0x3f8   :  { %v913_v53 = vmul.f32 %v1030_v50, %v911_v49  ;;  %vm918_vm8 = vweird.f32 %v1030_v50 }
 0x3f9   :  { %vm919_vm10 = vmor %vm917_vm9, %vm918_vm8 }
 0x3fa   :  { %v914_v54 = vsub.f32 1.0, %v913_v53 }
 0x3fc   :  { %v915_v56 = vmul.f32 %v1030_v50, %v914_v54 }
 0x3fe   :  { %v916_v15 = vadd.f32 %v1030_v50, %v915_v56 }
 0x400   :  { %v920_v16 = vsel %vm919_vm10, %v1030_v50, %v916_v15 }
 0x401   :  { %v925_v45 = vsel %vm922_vm11, %v924_v58, %v920_v16 }
 0x402   :  { %927 = vst [vmem:[#allocation4] sm:$0xff] %v925_v45 }
 0x403   :  { %990 = dma.vmem_to_hbm [thread:$0]  %s986_s13, 128, %s988_s24, [#allocation5]  }
 0x463   :  { %v965_v60 = vpop.f32.mrf.mxu0 }
 0x464   :  { %v966_v47 = vadd.f32 %v1024_v59, %v965_v60 }
 0x466   :  { %968 = vst [vmem:[#allocation6] sm:$0xff] %v966_v47 }
 0x467   :  { %1001 = dma.vmem_to_hbm [thread:$0]  %s997_s3, 128, %s999_s16, [#allocation5]  }
 0x468   :  { %1103 = dma.done.wait [#allocation3], 128  }
 0x469   :  { %1104 = vsyncadd [#allocation3], 4294967168 }
 0x46a   :  { %1105 = dma.done.wait [#allocation5], 256  }
 0x46b   :  { %1106 = vsyncadd [#allocation5], 4294967040 }
 0x46c   :  { %1014 = vsyncpa [#allocation3], 1 }
 0x46d   :  { %1015 = vsyncpa [#allocation5], 1 }

</bundles_post_ra>
